<compile_context>
chip_gen: v6e
topology: v6e:2x2x1
jax: 0.10.0
libtpu: 0.0.40
codegen_flags: <defaults>
</compile_context>

<pallas_src>
import math

import jax
import jax.numpy as jnp
import numpy as np
from jax.experimental import pallas as pl
from jax.experimental.pallas import tpu as pltpu  # noqa: F401  (kept for TPU backend utilities)

# ----------------------------- configuration --------------------------------
LAYER_NUM = 3          # number of layers being cross-attended (> 1)
LAYER_DIM = 8          # == sequence length (the fc Linear acts over this dim)
EMBED_DIM = 24         # must be divisible by NUM_HEADS
NUM_HEADS = 3
HEAD_DIM = EMBED_DIM // NUM_HEADS
BATCH = 2


# ------------------------------- kernel -------------------------------------
def _cross_layer_attn_kernel(x_ref, wqv_ref, bqv_ref, wkwo_ref, bk_ref,
                             mask_ref, wfc_ref, bias_ref, out_ref):
    # Derive static shapes from the refs (heads from the module constant).
    E = x_ref.shape[1]                  # embed dim
    LE = wqv_ref.shape[2]               # L * E
    L = LE // E                         # layers
    LS = mask_ref.shape[0]              # L * S
    S = LS // L                         # seq / layer_dim
    B = x_ref.shape[0] // LS            # batch
    H = NUM_HEADS
    Dh = E // H

    x = x_ref[...]                       # (B*L*S, E)   all batches & layers
    xT = x.T                             # (E, B*L*S)   one small XLU transpose

    # ---- fused projections: 3 wide matmuls instead of 27 tiny ones ---------
    # Q (scale pre-folded in the wrapper) and V for every layer/head/batch.
    q_all = jnp.dot(x, wqv_ref[0], preferred_element_type=jnp.float32) + bqv_ref[0]
    v_all = jnp.dot(x, wqv_ref[1], preferred_element_type=jnp.float32) + bqv_ref[1]
    # K already in transposed (output-dim major) form for the score matmuls.
    kT_all = (jnp.dot(wkwo_ref[0], xT, preferred_element_type=jnp.float32)
              + bk_ref[...])             # (L*E, B*L*S)

    mask = mask_ref[...]                 # (LS, LS) block-diag -1e30 (own layer)

    per_batch = []
    for b in range(B):                   # static unroll: batch folded into 1 step
        kT_b = kT_all[:, b * LS:(b + 1) * LS]          # (L*E, LS)
        v_b = v_all[b * LS:(b + 1) * LS, :]            # (LS, L*E)
        layer_outs = []
        for i in range(L):               # static unroll over layers
            r0 = b * LS + i * S
            neg = mask[i * S:(i + 1) * S, :]           # (S, LS)
            head_outs = []
            for h in range(H):           # static unroll over heads
                c0 = i * E + h * Dh
                q_h = q_all[r0:r0 + S, c0:c0 + Dh]     # (S, Dh)
                kT_h = kT_b[c0:c0 + Dh, :]             # (Dh, LS)
                v_h = v_b[:, c0:c0 + Dh]               # (LS, Dh)

                s = jnp.dot(q_h, kT_h, preferred_element_type=jnp.float32) + neg
                s = s - jnp.max(s, axis=-1, keepdims=True)
                p = jnp.exp(s)
                p = p / jnp.sum(p, axis=-1, keepdims=True)   # exact normalization
                head_outs.append(
                    jnp.dot(p, v_h, preferred_element_type=jnp.float32))  # (S, Dh)
            layer_outs.append(jnp.concatenate(head_outs, axis=1))   # (S, E)
        per_batch.append(jnp.concatenate(layer_outs, axis=1))       # (S, L*E)
    o_all = jnp.concatenate(per_batch, axis=0)                      # (B*S, L*E)

    # ---- output projection summed over layers: one matmul ------------------
    fused = jnp.dot(o_all, wkwo_ref[1], preferred_element_type=jnp.float32)  # (B*S, E)

    # ---- fc over the seq axis (block-diag over batch) + all additive biases --
    out = (jnp.dot(wfc_ref[...], fused, preferred_element_type=jnp.float32)
           + bias_ref[...])
    out_ref[...] = out.astype(out_ref.dtype)


# ------------------------------- wrapper -------------------------------------
def cross_layer_cross_attention(layer_outputs, params):
    """layer_outputs: list of L arrays (B, S, E).  Returns (B, S, E)."""
    wq, bq, wk, bk, wv, bv, wo, bo, wfc, bfc = params
    L = len(layer_outputs)
    B, S, E = layer_outputs[0].shape
    H = NUM_HEADS
    Dh = E // H
    LS, LE = L * S, L * E
    scale = 1.0 / math.sqrt(Dh)

    # activations: batch-major, layers stacked along the seq axis -> (B*L*S, E)
    x_all = jnp.concatenate(layer_outputs, axis=1).reshape(B * LS, E)

    # ---- trace-time weight packing (all transposes / splits outside kernel) ----
    wqT_all = jnp.transpose(wq, (2, 0, 1)).reshape(E, LE) * scale   # scale folded
    wvT_all = jnp.transpose(wv, (2, 0, 1)).reshape(E, LE)
    w_qv = jnp.stack([wqT_all, wvT_all], axis=0)                    # (2, E, L*E)
    b_qv = jnp.stack([bq.reshape(1, LE) * scale,
                      bv.reshape(1, LE)], axis=0)                   # (2, 1, L*E)

    wk_all = wk.reshape(LE, E)                                      # kT = Wk_all @ x.T
    woT_all = jnp.transpose(wo, (0, 2, 1)).reshape(LE, E)           # stacked Wo^T
    wk_wo = jnp.stack([wk_all, woT_all], axis=0)                    # (2, L*E, E)
    bk_col = bk.reshape(LE, 1)                                      # (L*E, 1)

    # own-layer additive mask, shared by every batch/head: block-diag -1e30
    lid = jnp.arange(LS) // S
    mask = jnp.where(lid[:, None] == lid[None, :], -1e30, 0.0).astype(jnp.float32)

    # fc over the seq axis, block-diagonal over batch -> a single in-kernel matmul
    wfc_bd = jnp.kron(jnp.eye(B, dtype=jnp.float32), wfc)           # (B*S, B*S)
    # Fold every remaining additive bias into one slab:
    #   Wfc @ (fused + bo_sum) + bfc == Wfc @ fused + rowsum(Wfc)*bo_sum + bfc
    bo_sum = jnp.sum(bo, axis=0).reshape(1, E)
    out_bias = jnp.sum(wfc, axis=1, keepdims=True) * bo_sum + bfc.reshape(S, 1)
    out_bias = jnp.tile(out_bias, (B, 1))                           # (B*S, E)

    # Single kernel step (no grid): the whole working set (< 100 KB) is DMA'd to
    # VMEM once; on v5e/v6e this removes the per-step pipeline overhead of the
    # old grid=(B,) version (v7x: latency-bound, single step is still the right call).
    out_flat = pl.pallas_call(
        _cross_layer_attn_kernel,
        out_shape=jax.ShapeDtypeStruct((B * S, E), jnp.float32),
    )(x_all, w_qv, b_qv, wk_wo, bk_col, mask, wfc_bd, out_bias)

    return out_flat.reshape(B, S, E)


# ------------------------- pure-JAX reference --------------------------------
def reference(layer_outputs, params):
    wq, bq, wk, bk, wv, bv, wo, bo, wfc, bfc = params
    L = len(layer_outputs)
    B, S, E = layer_outputs[0].shape
    H, Dh = NUM_HEADS, HEAD_DIM
    scale = 1.0 / math.sqrt(Dh)
    fused = jnp.zeros((B, S, E), jnp.float32)
    for i in range(L):
        q = layer_outputs[i]                                             # (B, S, E)
        ctx = jnp.concatenate([layer_outputs[j] for j in range(L) if j != i], axis=1)
        qp = q @ wq[i].T + bq[i]
        kp = ctx @ wk[i].T + bk[i]
        vp = ctx @ wv[i].T + bv[i]
        qp = qp.reshape(B, S, H, Dh).transpose(0, 2, 1, 3)
        kp = kp.reshape(B, -1, H, Dh).transpose(0, 2, 1, 3)
        vp = vp.reshape(B, -1, H, Dh).transpose(0, 2, 1, 3)
        s = jnp.einsum('bhqd,bhkd->bhqk', qp * scale, kp)
        p = jax.nn.softmax(s, axis=-1)
        o = jnp.einsum('bhqk,bhkd->bhqd', p, vp).transpose(0, 2, 1, 3).reshape(B, S, E)
        fused = fused + (o @ wo[i].T + bo[i])
    out = jnp.einsum('st,bte->bse', wfc, fused) + bfc.reshape(1, S, 1)
    return out


# ----------------------------- parameter init --------------------------------
def init_params(key):
    L, S, E = LAYER_NUM, LAYER_DIM, EMBED_DIM
    ks = jax.random.split(key, 10)
    wq = jax.random.normal(ks[0], (L, E, E), jnp.float32) * 0.1
    wk = jax.random.normal(ks[1], (L, E, E), jnp.float32) * 0.1
    wv = jax.random.normal(ks[2], (L, E, E), jnp.float32) * 0.1
    wo = jax.random.normal(ks[3], (L, E, E), jnp.float32) * 0.1
    bq = jax.random.normal(ks[4], (L, 1, E), jnp.float32) * 0.1
    bk = jax.random.normal(ks[5], (L, 1, E), jnp.float32) * 0.1
    bv = jax.random.normal(ks[6], (L, 1, E), jnp.float32) * 0.1
    bo = jax.random.normal(ks[7], (L, 1, E), jnp.float32) * 0.1
    wfc = jax.random.normal(ks[8], (S, S), jnp.float32) * 0.1
    bfc = jax.random.normal(ks[9], (1, S), jnp.float32) * 0.1
    return (wq, bq, wk, bk, wv, bv, wo, bo, wfc, bfc)


if __name__ == "__main__":
    key = jax.random.PRNGKey(0)
    kx, kparams = jax.random.split(key)
    x = jax.random.normal(kx, (LAYER_NUM, BATCH, LAYER_DIM, EMBED_DIM), jnp.float32)
    params = init_params(kparams)
    layer_outputs = [x[i] for i in range(LAYER_NUM)]

    out = cross_layer_cross_attention(layer_outputs, params)
    out = jax.block_until_ready(out)

    ref = reference(layer_outputs, params)
    assert out.shape == (BATCH, LAYER_DIM, EMBED_DIM)
    np.testing.assert_allclose(np.asarray(out), np.asarray(ref), rtol=5e-3, atol=1e-3)
    print("KERNEL_OK")
</pallas_src>

<mosaic_0001>
module attributes {stable_mosaic.version = 11 : i64} {
  func.func @_cross_layer_attn_kernel(%arg0: memref<48x24xf32, #tpu.memory_space<vmem>>, %arg1: memref<2x24x72xf32, #tpu.memory_space<vmem>>, %arg2: memref<2x1x72xf32, #tpu.memory_space<vmem>>, %arg3: memref<2x72x24xf32, #tpu.memory_space<vmem>>, %arg4: memref<72x1xf32, #tpu.memory_space<vmem>>, %arg5: memref<24x24xf32, #tpu.memory_space<vmem>>, %arg6: memref<16x16xf32, #tpu.memory_space<vmem>>, %arg7: memref<16x24xf32, #tpu.memory_space<vmem>>, %arg8: memref<16x24xf32, #tpu.memory_space<vmem>>) attributes {dimension_semantics = [], scalar_prefetch = 0 : i64, scratch_operands = 0 : i64, tpu.core_type = #tpu.core_type<tc>} {
    %c0 = arith.constant 0 : index
    %c0_0 = arith.constant 0 : index
    %0 = vector.load %arg0[%c0, %c0_0] : memref<48x24xf32, #tpu.memory_space<vmem>>, vector<48x24xf32>
    %1 = tpu.transpose %0, [1, 0] : vector<48x24xf32> -> vector<24x48xf32>
    %c0_1 = arith.constant 0 : index
    %c0_2 = arith.constant 0 : index
    %c0_3 = arith.constant 0 : index
    %2 = vector.load %arg1[%c0_1, %c0_2, %c0_3] : memref<2x24x72xf32, #tpu.memory_space<vmem>>, vector<1x24x72xf32>
    %3 = vector.shape_cast %2 : vector<1x24x72xf32> to vector<24x72xf32>
    %cst = arith.constant dense<0.000000e+00> : vector<48x72xf32>
    %4 = tpu.matmul %0, %3, %cst {dimension_numbers = #tpu.dot_dimension_numbers<[1], [0], [0], [1], [0, 0, 1, 1], [], []>} : vector<48x24xf32>, vector<24x72xf32>, vector<48x72xf32> -> vector<48x72xf32>
    %c0_4 = arith.constant 0 : index
    %c0_5 = arith.constant 0 : index
    %c0_6 = arith.constant 0 : index
    %5 = vector.load %arg2[%c0_4, %c0_5, %c0_6] : memref<2x1x72xf32, #tpu.memory_space<vmem>>, vector<1x1x72xf32>
    %6 = vector.shape_cast %5 : vector<1x1x72xf32> to vector<1x72xf32>
    %7 = vector.broadcast %6 : vector<1x72xf32> to vector<48x72xf32>
    %8 = arith.addf %4, %7 : vector<48x72xf32>
    %c1 = arith.constant 1 : index
    %c0_7 = arith.constant 0 : index
    %c0_8 = arith.constant 0 : index
    %9 = vector.load %arg1[%c1, %c0_7, %c0_8] : memref<2x24x72xf32, #tpu.memory_space<vmem>>, vector<1x24x72xf32>
    %10 = vector.shape_cast %9 : vector<1x24x72xf32> to vector<24x72xf32>
    %cst_9 = arith.constant dense<0.000000e+00> : vector<48x72xf32>
    %11 = tpu.matmul %0, %10, %cst_9 {dimension_numbers = #tpu.dot_dimension_numbers<[1], [0], [0], [1], [0, 0, 1, 1], [], []>} : vector<48x24xf32>, vector<24x72xf32>, vector<48x72xf32> -> vector<48x72xf32>
    %c1_10 = arith.constant 1 : index
    %c0_11 = arith.constant 0 : index
    %c0_12 = arith.constant 0 : index
    %12 = vector.load %arg2[%c1_10, %c0_11, %c0_12] : memref<2x1x72xf32, #tpu.memory_space<vmem>>, vector<1x1x72xf32>
    %13 = vector.shape_cast %12 : vector<1x1x72xf32> to vector<1x72xf32>
    %14 = vector.broadcast %13 : vector<1x72xf32> to vector<48x72xf32>
    %15 = arith.addf %11, %14 : vector<48x72xf32>
    %c0_13 = arith.constant 0 : index
    %c0_14 = arith.constant 0 : index
    %c0_15 = arith.constant 0 : index
    %16 = vector.load %arg3[%c0_13, %c0_14, %c0_15] : memref<2x72x24xf32, #tpu.memory_space<vmem>>, vector<1x72x24xf32>
    %17 = vector.shape_cast %16 : vector<1x72x24xf32> to vector<72x24xf32>
    %cst_16 = arith.constant dense<0.000000e+00> : vector<72x48xf32>
    %18 = tpu.matmul %17, %1, %cst_16 {dimension_numbers = #tpu.dot_dimension_numbers<[1], [0], [0], [1], [0, 0, 1, 1], [], []>} : vector<72x24xf32>, vector<24x48xf32>, vector<72x48xf32> -> vector<72x48xf32>
    %c0_17 = arith.constant 0 : index
    %c0_18 = arith.constant 0 : index
    %19 = vector.load %arg4[%c0_17, %c0_18] : memref<72x1xf32, #tpu.memory_space<vmem>>, vector<72x1xf32>
    %20 = vector.broadcast %19 : vector<72x1xf32> to vector<72x48xf32>
    %21 = arith.addf %18, %20 : vector<72x48xf32>
    %c0_19 = arith.constant 0 : index
    %c0_20 = arith.constant 0 : index
    %22 = vector.load %arg5[%c0_19, %c0_20] : memref<24x24xf32, #tpu.memory_space<vmem>>, vector<24x24xf32>
    %23 = vector.extract_strided_slice %21 {offsets = [0, 0], sizes = [72, 24], strides = [1, 1]} : vector<72x48xf32> to vector<72x24xf32>
    %24 = vector.extract_strided_slice %15 {offsets = [0, 0], sizes = [24, 72], strides = [1, 1]} : vector<48x72xf32> to vector<24x72xf32>
    %25 = vector.extract_strided_slice %22 {offsets = [0, 0], sizes = [8, 24], strides = [1, 1]} : vector<24x24xf32> to vector<8x24xf32>
    %26 = vector.extract_strided_slice %8 {offsets = [0, 0], sizes = [8, 8], strides = [1, 1]} : vector<48x72xf32> to vector<8x8xf32>
    %27 = vector.extract_strided_slice %23 {offsets = [0, 0], sizes = [8, 24], strides = [1, 1]} : vector<72x24xf32> to vector<8x24xf32>
    %28 = vector.extract_strided_slice %24 {offsets = [0, 0], sizes = [24, 8], strides = [1, 1]} : vector<24x72xf32> to vector<24x8xf32>
    %cst_21 = arith.constant dense<0.000000e+00> : vector<8x24xf32>
    %29 = tpu.matmul %26, %27, %cst_21 {dimension_numbers = #tpu.dot_dimension_numbers<[1], [0], [0], [1], [0, 0, 1, 1], [], []>} : vector<8x8xf32>, vector<8x24xf32>, vector<8x24xf32> -> vector<8x24xf32>
    %30 = arith.addf %29, %25 : vector<8x24xf32>
    %cst_22 = arith.constant dense<0xFF800000> : vector<8xf32>
    %31 = vector.multi_reduction <maximumf>, %30, %cst_22 [1] : vector<8x24xf32> to vector<8xf32>
    %32 = vector.shape_cast %31 : vector<8xf32> to vector<8x1xf32>
    %33 = vector.broadcast %32 : vector<8x1xf32> to vector<8x24xf32>
    %34 = arith.subf %30, %33 : vector<8x24xf32>
    %35 = math.exp %34 : vector<8x24xf32>
    %cst_23 = arith.constant dense<0.000000e+00> : vector<8xf32>
    %36 = vector.multi_reduction <add>, %35, %cst_23 [1] : vector<8x24xf32> to vector<8xf32>
    %37 = vector.shape_cast %36 : vector<8xf32> to vector<8x1xf32>
    %38 = vector.broadcast %37 : vector<8x1xf32> to vector<8x24xf32>
    %39 = arith.divf %35, %38 : vector<8x24xf32>
    %cst_24 = arith.constant dense<0.000000e+00> : vector<8x8xf32>
    %40 = tpu.matmul %39, %28, %cst_24 {dimension_numbers = #tpu.dot_dimension_numbers<[1], [0], [0], [1], [0, 0, 1, 1], [], []>} : vector<8x24xf32>, vector<24x8xf32>, vector<8x8xf32> -> vector<8x8xf32>
    %41 = vector.extract_strided_slice %8 {offsets = [0, 8], sizes = [8, 8], strides = [1, 1]} : vector<48x72xf32> to vector<8x8xf32>
    %42 = vector.extract_strided_slice %23 {offsets = [8, 0], sizes = [8, 24], strides = [1, 1]} : vector<72x24xf32> to vector<8x24xf32>
    %43 = vector.extract_strided_slice %24 {offsets = [0, 8], sizes = [24, 8], strides = [1, 1]} : vector<24x72xf32> to vector<24x8xf32>
    %cst_25 = arith.constant dense<0.000000e+00> : vector<8x24xf32>
    %44 = tpu.matmul %41, %42, %cst_25 {dimension_numbers = #tpu.dot_dimension_numbers<[1], [0], [0], [1], [0, 0, 1, 1], [], []>} : vector<8x8xf32>, vector<8x24xf32>, vector<8x24xf32> -> vector<8x24xf32>
    %45 = arith.addf %44, %25 : vector<8x24xf32>
    %cst_26 = arith.constant dense<0xFF800000> : vector<8xf32>
    %46 = vector.multi_reduction <maximumf>, %45, %cst_26 [1] : vector<8x24xf32> to vector<8xf32>
    %47 = vector.shape_cast %46 : vector<8xf32> to vector<8x1xf32>
    %48 = vector.broadcast %47 : vector<8x1xf32> to vector<8x24xf32>
    %49 = arith.subf %45, %48 : vector<8x24xf32>
    %50 = math.exp %49 : vector<8x24xf32>
    %cst_27 = arith.constant dense<0.000000e+00> : vector<8xf32>
    %51 = vector.multi_reduction <add>, %50, %cst_27 [1] : vector<8x24xf32> to vector<8xf32>
    %52 = vector.shape_cast %51 : vector<8xf32> to vector<8x1xf32>
    %53 = vector.broadcast %52 : vector<8x1xf32> to vector<8x24xf32>
    %54 = arith.divf %50, %53 : vector<8x24xf32>
    %cst_28 = arith.constant dense<0.000000e+00> : vector<8x8xf32>
    %55 = tpu.matmul %54, %43, %cst_28 {dimension_numbers = #tpu.dot_dimension_numbers<[1], [0], [0], [1], [0, 0, 1, 1], [], []>} : vector<8x24xf32>, vector<24x8xf32>, vector<8x8xf32> -> vector<8x8xf32>
    %56 = vector.extract_strided_slice %8 {offsets = [0, 16], sizes = [8, 8], strides = [1, 1]} : vector<48x72xf32> to vector<8x8xf32>
    %57 = vector.extract_strided_slice %23 {offsets = [16, 0], sizes = [8, 24], strides = [1, 1]} : vector<72x24xf32> to vector<8x24xf32>
    %58 = vector.extract_strided_slice %24 {offsets = [0, 16], sizes = [24, 8], strides = [1, 1]} : vector<24x72xf32> to vector<24x8xf32>
    %cst_29 = arith.constant dense<0.000000e+00> : vector<8x24xf32>
    %59 = tpu.matmul %56, %57, %cst_29 {dimension_numbers = #tpu.dot_dimension_numbers<[1], [0], [0], [1], [0, 0, 1, 1], [], []>} : vector<8x8xf32>, vector<8x24xf32>, vector<8x24xf32> -> vector<8x24xf32>
    %60 = arith.addf %59, %25 : vector<8x24xf32>
    %cst_30 = arith.constant dense<0xFF800000> : vector<8xf32>
    %61 = vector.multi_reduction <maximumf>, %60, %cst_30 [1] : vector<8x24xf32> to vector<8xf32>
    %62 = vector.shape_cast %61 : vector<8xf32> to vector<8x1xf32>
    %63 = vector.broadcast %62 : vector<8x1xf32> to vector<8x24xf32>
    %64 = arith.subf %60, %63 : vector<8x24xf32>
    %65 = math.exp %64 : vector<8x24xf32>
    %cst_31 = arith.constant dense<0.000000e+00> : vector<8xf32>
    %66 = vector.multi_reduction <add>, %65, %cst_31 [1] : vector<8x24xf32> to vector<8xf32>
    %67 = vector.shape_cast %66 : vector<8xf32> to vector<8x1xf32>
    %68 = vector.broadcast %67 : vector<8x1xf32> to vector<8x24xf32>
    %69 = arith.divf %65, %68 : vector<8x24xf32>
    %cst_32 = arith.constant dense<0.000000e+00> : vector<8x8xf32>
    %70 = tpu.matmul %69, %58, %cst_32 {dimension_numbers = #tpu.dot_dimension_numbers<[1], [0], [0], [1], [0, 0, 1, 1], [], []>} : vector<8x24xf32>, vector<24x8xf32>, vector<8x8xf32> -> vector<8x8xf32>
    %71 = tpu.concatenate %40, %55, %70 in 1 : vector<8x8xf32>, vector<8x8xf32>, vector<8x8xf32> -> vector<8x24xf32>
    %72 = vector.extract_strided_slice %22 {offsets = [8, 0], sizes = [8, 24], strides = [1, 1]} : vector<24x24xf32> to vector<8x24xf32>
    %73 = vector.extract_strided_slice %8 {offsets = [8, 24], sizes = [8, 8], strides = [1, 1]} : vector<48x72xf32> to vector<8x8xf32>
    %74 = vector.extract_strided_slice %23 {offsets = [24, 0], sizes = [8, 24], strides = [1, 1]} : vector<72x24xf32> to vector<8x24xf32>
    %75 = vector.extract_strided_slice %24 {offsets = [0, 24], sizes = [24, 8], strides = [1, 1]} : vector<24x72xf32> to vector<24x8xf32>
    %cst_33 = arith.constant dense<0.000000e+00> : vector<8x24xf32>
    %76 = tpu.matmul %73, %74, %cst_33 {dimension_numbers = #tpu.dot_dimension_numbers<[1], [0], [0], [1], [0, 0, 1, 1], [], []>} : vector<8x8xf32>, vector<8x24xf32>, vector<8x24xf32> -> vector<8x24xf32>
    %77 = arith.addf %76, %72 : vector<8x24xf32>
    %cst_34 = arith.constant dense<0xFF800000> : vector<8xf32>
    %78 = vector.multi_reduction <maximumf>, %77, %cst_34 [1] : vector<8x24xf32> to vector<8xf32>
    %79 = vector.shape_cast %78 : vector<8xf32> to vector<8x1xf32>
    %80 = vector.broadcast %79 : vector<8x1xf32> to vector<8x24xf32>
    %81 = arith.subf %77, %80 : vector<8x24xf32>
    %82 = math.exp %81 : vector<8x24xf32>
    %cst_35 = arith.constant dense<0.000000e+00> : vector<8xf32>
    %83 = vector.multi_reduction <add>, %82, %cst_35 [1] : vector<8x24xf32> to vector<8xf32>
    %84 = vector.shape_cast %83 : vector<8xf32> to vector<8x1xf32>
    %85 = vector.broadcast %84 : vector<8x1xf32> to vector<8x24xf32>
    %86 = arith.divf %82, %85 : vector<8x24xf32>
    %cst_36 = arith.constant dense<0.000000e+00> : vector<8x8xf32>
    %87 = tpu.matmul %86, %75, %cst_36 {dimension_numbers = #tpu.dot_dimension_numbers<[1], [0], [0], [1], [0, 0, 1, 1], [], []>} : vector<8x24xf32>, vector<24x8xf32>, vector<8x8xf32> -> vector<8x8xf32>
    %88 = vector.extract_strided_slice %8 {offsets = [8, 32], sizes = [8, 8], strides = [1, 1]} : vector<48x72xf32> to vector<8x8xf32>
    %89 = vector.extract_strided_slice %23 {offsets = [32, 0], sizes = [8, 24], strides = [1, 1]} : vector<72x24xf32> to vector<8x24xf32>
    %90 = vector.extract_strided_slice %24 {offsets = [0, 32], sizes = [24, 8], strides = [1, 1]} : vector<24x72xf32> to vector<24x8xf32>
    %cst_37 = arith.constant dense<0.000000e+00> : vector<8x24xf32>
    %91 = tpu.matmul %88, %89, %cst_37 {dimension_numbers = #tpu.dot_dimension_numbers<[1], [0], [0], [1], [0, 0, 1, 1], [], []>} : vector<8x8xf32>, vector<8x24xf32>, vector<8x24xf32> -> vector<8x24xf32>
    %92 = arith.addf %91, %72 : vector<8x24xf32>
    %cst_38 = arith.constant dense<0xFF800000> : vector<8xf32>
    %93 = vector.multi_reduction <maximumf>, %92, %cst_38 [1] : vector<8x24xf32> to vector<8xf32>
    %94 = vector.shape_cast %93 : vector<8xf32> to vector<8x1xf32>
    %95 = vector.broadcast %94 : vector<8x1xf32> to vector<8x24xf32>
    %96 = arith.subf %92, %95 : vector<8x24xf32>
    %97 = math.exp %96 : vector<8x24xf32>
    %cst_39 = arith.constant dense<0.000000e+00> : vector<8xf32>
    %98 = vector.multi_reduction <add>, %97, %cst_39 [1] : vector<8x24xf32> to vector<8xf32>
    %99 = vector.shape_cast %98 : vector<8xf32> to vector<8x1xf32>
    %100 = vector.broadcast %99 : vector<8x1xf32> to vector<8x24xf32>
    %101 = arith.divf %97, %100 : vector<8x24xf32>
    %cst_40 = arith.constant dense<0.000000e+00> : vector<8x8xf32>
    %102 = tpu.matmul %101, %90, %cst_40 {dimension_numbers = #tpu.dot_dimension_numbers<[1], [0], [0], [1], [0, 0, 1, 1], [], []>} : vector<8x24xf32>, vector<24x8xf32>, vector<8x8xf32> -> vector<8x8xf32>
    %103 = vector.extract_strided_slice %8 {offsets = [8, 40], sizes = [8, 8], strides = [1, 1]} : vector<48x72xf32> to vector<8x8xf32>
    %104 = vector.extract_strided_slice %23 {offsets = [40, 0], sizes = [8, 24], strides = [1, 1]} : vector<72x24xf32> to vector<8x24xf32>
    %105 = vector.extract_strided_slice %24 {offsets = [0, 40], sizes = [24, 8], strides = [1, 1]} : vector<24x72xf32> to vector<24x8xf32>
    %cst_41 = arith.constant dense<0.000000e+00> : vector<8x24xf32>
    %106 = tpu.matmul %103, %104, %cst_41 {dimension_numbers = #tpu.dot_dimension_numbers<[1], [0], [0], [1], [0, 0, 1, 1], [], []>} : vector<8x8xf32>, vector<8x24xf32>, vector<8x24xf32> -> vector<8x24xf32>
    %107 = arith.addf %106, %72 : vector<8x24xf32>
    %cst_42 = arith.constant dense<0xFF800000> : vector<8xf32>
    %108 = vector.multi_reduction <maximumf>, %107, %cst_42 [1] : vector<8x24xf32> to vector<8xf32>
    %109 = vector.shape_cast %108 : vector<8xf32> to vector<8x1xf32>
    %110 = vector.broadcast %109 : vector<8x1xf32> to vector<8x24xf32>
    %111 = arith.subf %107, %110 : vector<8x24xf32>
    %112 = math.exp %111 : vector<8x24xf32>
    %cst_43 = arith.constant dense<0.000000e+00> : vector<8xf32>
    %113 = vector.multi_reduction <add>, %112, %cst_43 [1] : vector<8x24xf32> to vector<8xf32>
    %114 = vector.shape_cast %113 : vector<8xf32> to vector<8x1xf32>
    %115 = vector.broadcast %114 : vector<8x1xf32> to vector<8x24xf32>
    %116 = arith.divf %112, %115 : vector<8x24xf32>
    %cst_44 = arith.constant dense<0.000000e+00> : vector<8x8xf32>
    %117 = tpu.matmul %116, %105, %cst_44 {dimension_numbers = #tpu.dot_dimension_numbers<[1], [0], [0], [1], [0, 0, 1, 1], [], []>} : vector<8x24xf32>, vector<24x8xf32>, vector<8x8xf32> -> vector<8x8xf32>
    %118 = tpu.concatenate %87, %102, %117 in 1 : vector<8x8xf32>, vector<8x8xf32>, vector<8x8xf32> -> vector<8x24xf32>
    %119 = vector.extract_strided_slice %22 {offsets = [16, 0], sizes = [8, 24], strides = [1, 1]} : vector<24x24xf32> to vector<8x24xf32>
    %120 = vector.extract_strided_slice %8 {offsets = [16, 48], sizes = [8, 8], strides = [1, 1]} : vector<48x72xf32> to vector<8x8xf32>
    %121 = vector.extract_strided_slice %23 {offsets = [48, 0], sizes = [8, 24], strides = [1, 1]} : vector<72x24xf32> to vector<8x24xf32>
    %122 = vector.extract_strided_slice %24 {offsets = [0, 48], sizes = [24, 8], strides = [1, 1]} : vector<24x72xf32> to vector<24x8xf32>
    %cst_45 = arith.constant dense<0.000000e+00> : vector<8x24xf32>
    %123 = tpu.matmul %120, %121, %cst_45 {dimension_numbers = #tpu.dot_dimension_numbers<[1], [0], [0], [1], [0, 0, 1, 1], [], []>} : vector<8x8xf32>, vector<8x24xf32>, vector<8x24xf32> -> vector<8x24xf32>
    %124 = arith.addf %123, %119 : vector<8x24xf32>
    %cst_46 = arith.constant dense<0xFF800000> : vector<8xf32>
    %125 = vector.multi_reduction <maximumf>, %124, %cst_46 [1] : vector<8x24xf32> to vector<8xf32>
    %126 = vector.shape_cast %125 : vector<8xf32> to vector<8x1xf32>
    %127 = vector.broadcast %126 : vector<8x1xf32> to vector<8x24xf32>
    %128 = arith.subf %124, %127 : vector<8x24xf32>
    %129 = math.exp %128 : vector<8x24xf32>
    %cst_47 = arith.constant dense<0.000000e+00> : vector<8xf32>
    %130 = vector.multi_reduction <add>, %129, %cst_47 [1] : vector<8x24xf32> to vector<8xf32>
    %131 = vector.shape_cast %130 : vector<8xf32> to vector<8x1xf32>
    %132 = vector.broadcast %131 : vector<8x1xf32> to vector<8x24xf32>
    %133 = arith.divf %129, %132 : vector<8x24xf32>
    %cst_48 = arith.constant dense<0.000000e+00> : vector<8x8xf32>
    %134 = tpu.matmul %133, %122, %cst_48 {dimension_numbers = #tpu.dot_dimension_numbers<[1], [0], [0], [1], [0, 0, 1, 1], [], []>} : vector<8x24xf32>, vector<24x8xf32>, vector<8x8xf32> -> vector<8x8xf32>
    %135 = vector.extract_strided_slice %8 {offsets = [16, 56], sizes = [8, 8], strides = [1, 1]} : vector<48x72xf32> to vector<8x8xf32>
    %136 = vector.extract_strided_slice %23 {offsets = [56, 0], sizes = [8, 24], strides = [1, 1]} : vector<72x24xf32> to vector<8x24xf32>
    %137 = vector.extract_strided_slice %24 {offsets = [0, 56], sizes = [24, 8], strides = [1, 1]} : vector<24x72xf32> to vector<24x8xf32>
    %cst_49 = arith.constant dense<0.000000e+00> : vector<8x24xf32>
    %138 = tpu.matmul %135, %136, %cst_49 {dimension_numbers = #tpu.dot_dimension_numbers<[1], [0], [0], [1], [0, 0, 1, 1], [], []>} : vector<8x8xf32>, vector<8x24xf32>, vector<8x24xf32> -> vector<8x24xf32>
    %139 = arith.addf %138, %119 : vector<8x24xf32>
    %cst_50 = arith.constant dense<0xFF800000> : vector<8xf32>
    %140 = vector.multi_reduction <maximumf>, %139, %cst_50 [1] : vector<8x24xf32> to vector<8xf32>
    %141 = vector.shape_cast %140 : vector<8xf32> to vector<8x1xf32>
    %142 = vector.broadcast %141 : vector<8x1xf32> to vector<8x24xf32>
    %143 = arith.subf %139, %142 : vector<8x24xf32>
    %144 = math.exp %143 : vector<8x24xf32>
    %cst_51 = arith.constant dense<0.000000e+00> : vector<8xf32>
    %145 = vector.multi_reduction <add>, %144, %cst_51 [1] : vector<8x24xf32> to vector<8xf32>
    %146 = vector.shape_cast %145 : vector<8xf32> to vector<8x1xf32>
    %147 = vector.broadcast %146 : vector<8x1xf32> to vector<8x24xf32>
    %148 = arith.divf %144, %147 : vector<8x24xf32>
    %cst_52 = arith.constant dense<0.000000e+00> : vector<8x8xf32>
    %149 = tpu.matmul %148, %137, %cst_52 {dimension_numbers = #tpu.dot_dimension_numbers<[1], [0], [0], [1], [0, 0, 1, 1], [], []>} : vector<8x24xf32>, vector<24x8xf32>, vector<8x8xf32> -> vector<8x8xf32>
    %150 = vector.extract_strided_slice %8 {offsets = [16, 64], sizes = [8, 8], strides = [1, 1]} : vector<48x72xf32> to vector<8x8xf32>
    %151 = vector.extract_strided_slice %23 {offsets = [64, 0], sizes = [8, 24], strides = [1, 1]} : vector<72x24xf32> to vector<8x24xf32>
    %152 = vector.extract_strided_slice %24 {offsets = [0, 64], sizes = [24, 8], strides = [1, 1]} : vector<24x72xf32> to vector<24x8xf32>
    %cst_53 = arith.constant dense<0.000000e+00> : vector<8x24xf32>
    %153 = tpu.matmul %150, %151, %cst_53 {dimension_numbers = #tpu.dot_dimension_numbers<[1], [0], [0], [1], [0, 0, 1, 1], [], []>} : vector<8x8xf32>, vector<8x24xf32>, vector<8x24xf32> -> vector<8x24xf32>
    %154 = arith.addf %153, %119 : vector<8x24xf32>
    %cst_54 = arith.constant dense<0xFF800000> : vector<8xf32>
    %155 = vector.multi_reduction <maximumf>, %154, %cst_54 [1] : vector<8x24xf32> to vector<8xf32>
    %156 = vector.shape_cast %155 : vector<8xf32> to vector<8x1xf32>
    %157 = vector.broadcast %156 : vector<8x1xf32> to vector<8x24xf32>
    %158 = arith.subf %154, %157 : vector<8x24xf32>
    %159 = math.exp %158 : vector<8x24xf32>
    %cst_55 = arith.constant dense<0.000000e+00> : vector<8xf32>
    %160 = vector.multi_reduction <add>, %159, %cst_55 [1] : vector<8x24xf32> to vector<8xf32>
    %161 = vector.shape_cast %160 : vector<8xf32> to vector<8x1xf32>
    %162 = vector.broadcast %161 : vector<8x1xf32> to vector<8x24xf32>
    %163 = arith.divf %159, %162 : vector<8x24xf32>
    %cst_56 = arith.constant dense<0.000000e+00> : vector<8x8xf32>
    %164 = tpu.matmul %163, %152, %cst_56 {dimension_numbers = #tpu.dot_dimension_numbers<[1], [0], [0], [1], [0, 0, 1, 1], [], []>} : vector<8x24xf32>, vector<24x8xf32>, vector<8x8xf32> -> vector<8x8xf32>
    %165 = tpu.concatenate %134, %149, %164 in 1 : vector<8x8xf32>, vector<8x8xf32>, vector<8x8xf32> -> vector<8x24xf32>
    %166 = tpu.concatenate %71, %118, %165 in 1 : vector<8x24xf32>, vector<8x24xf32>, vector<8x24xf32> -> vector<8x72xf32>
    %167 = vector.extract_strided_slice %21 {offsets = [0, 24], sizes = [72, 24], strides = [1, 1]} : vector<72x48xf32> to vector<72x24xf32>
    %168 = vector.extract_strided_slice %15 {offsets = [24, 0], sizes = [24, 72], strides = [1, 1]} : vector<48x72xf32> to vector<24x72xf32>
    %169 = vector.extract_strided_slice %22 {offsets = [0, 0], sizes = [8, 24], strides = [1, 1]} : vector<24x24xf32> to vector<8x24xf32>
    %170 = vector.extract_strided_slice %8 {offsets = [24, 0], sizes = [8, 8], strides = [1, 1]} : vector<48x72xf32> to vector<8x8xf32>
    %171 = vector.extract_strided_slice %167 {offsets = [0, 0], sizes = [8, 24], strides = [1, 1]} : vector<72x24xf32> to vector<8x24xf32>
    %172 = vector.extract_strided_slice %168 {offsets = [0, 0], sizes = [24, 8], strides = [1, 1]} : vector<24x72xf32> to vector<24x8xf32>
    %cst_57 = arith.constant dense<0.000000e+00> : vector<8x24xf32>
    %173 = tpu.matmul %170, %171, %cst_57 {dimension_numbers = #tpu.dot_dimension_numbers<[1], [0], [0], [1], [0, 0, 1, 1], [], []>} : vector<8x8xf32>, vector<8x24xf32>, vector<8x24xf32> -> vector<8x24xf32>
    %174 = arith.addf %173, %169 : vector<8x24xf32>
    %cst_58 = arith.constant dense<0xFF800000> : vector<8xf32>
    %175 = vector.multi_reduction <maximumf>, %174, %cst_58 [1] : vector<8x24xf32> to vector<8xf32>
    %176 = vector.shape_cast %175 : vector<8xf32> to vector<8x1xf32>
    %177 = vector.broadcast %176 : vector<8x1xf32> to vector<8x24xf32>
    %178 = arith.subf %174, %177 : vector<8x24xf32>
    %179 = math.exp %178 : vector<8x24xf32>
    %cst_59 = arith.constant dense<0.000000e+00> : vector<8xf32>
    %180 = vector.multi_reduction <add>, %179, %cst_59 [1] : vector<8x24xf32> to vector<8xf32>
    %181 = vector.shape_cast %180 : vector<8xf32> to vector<8x1xf32>
    %182 = vector.broadcast %181 : vector<8x1xf32> to vector<8x24xf32>
    %183 = arith.divf %179, %182 : vector<8x24xf32>
    %cst_60 = arith.constant dense<0.000000e+00> : vector<8x8xf32>
    %184 = tpu.matmul %183, %172, %cst_60 {dimension_numbers = #tpu.dot_dimension_numbers<[1], [0], [0], [1], [0, 0, 1, 1], [], []>} : vector<8x24xf32>, vector<24x8xf32>, vector<8x8xf32> -> vector<8x8xf32>
    %185 = vector.extract_strided_slice %8 {offsets = [24, 8], sizes = [8, 8], strides = [1, 1]} : vector<48x72xf32> to vector<8x8xf32>
    %186 = vector.extract_strided_slice %167 {offsets = [8, 0], sizes = [8, 24], strides = [1, 1]} : vector<72x24xf32> to vector<8x24xf32>
    %187 = vector.extract_strided_slice %168 {offsets = [0, 8], sizes = [24, 8], strides = [1, 1]} : vector<24x72xf32> to vector<24x8xf32>
    %cst_61 = arith.constant dense<0.000000e+00> : vector<8x24xf32>
    %188 = tpu.matmul %185, %186, %cst_61 {dimension_numbers = #tpu.dot_dimension_numbers<[1], [0], [0], [1], [0, 0, 1, 1], [], []>} : vector<8x8xf32>, vector<8x24xf32>, vector<8x24xf32> -> vector<8x24xf32>
    %189 = arith.addf %188, %169 : vector<8x24xf32>
    %cst_62 = arith.constant dense<0xFF800000> : vector<8xf32>
    %190 = vector.multi_reduction <maximumf>, %189, %cst_62 [1] : vector<8x24xf32> to vector<8xf32>
    %191 = vector.shape_cast %190 : vector<8xf32> to vector<8x1xf32>
    %192 = vector.broadcast %191 : vector<8x1xf32> to vector<8x24xf32>
    %193 = arith.subf %189, %192 : vector<8x24xf32>
    %194 = math.exp %193 : vector<8x24xf32>
    %cst_63 = arith.constant dense<0.000000e+00> : vector<8xf32>
    %195 = vector.multi_reduction <add>, %194, %cst_63 [1] : vector<8x24xf32> to vector<8xf32>
    %196 = vector.shape_cast %195 : vector<8xf32> to vector<8x1xf32>
    %197 = vector.broadcast %196 : vector<8x1xf32> to vector<8x24xf32>
    %198 = arith.divf %194, %197 : vector<8x24xf32>
    %cst_64 = arith.constant dense<0.000000e+00> : vector<8x8xf32>
    %199 = tpu.matmul %198, %187, %cst_64 {dimension_numbers = #tpu.dot_dimension_numbers<[1], [0], [0], [1], [0, 0, 1, 1], [], []>} : vector<8x24xf32>, vector<24x8xf32>, vector<8x8xf32> -> vector<8x8xf32>
    %200 = vector.extract_strided_slice %8 {offsets = [24, 16], sizes = [8, 8], strides = [1, 1]} : vector<48x72xf32> to vector<8x8xf32>
    %201 = vector.extract_strided_slice %167 {offsets = [16, 0], sizes = [8, 24], strides = [1, 1]} : vector<72x24xf32> to vector<8x24xf32>
    %202 = vector.extract_strided_slice %168 {offsets = [0, 16], sizes = [24, 8], strides = [1, 1]} : vector<24x72xf32> to vector<24x8xf32>
    %cst_65 = arith.constant dense<0.000000e+00> : vector<8x24xf32>
    %203 = tpu.matmul %200, %201, %cst_65 {dimension_numbers = #tpu.dot_dimension_numbers<[1], [0], [0], [1], [0, 0, 1, 1], [], []>} : vector<8x8xf32>, vector<8x24xf32>, vector<8x24xf32> -> vector<8x24xf32>
    %204 = arith.addf %203, %169 : vector<8x24xf32>
    %cst_66 = arith.constant dense<0xFF800000> : vector<8xf32>
    %205 = vector.multi_reduction <maximumf>, %204, %cst_66 [1] : vector<8x24xf32> to vector<8xf32>
    %206 = vector.shape_cast %205 : vector<8xf32> to vector<8x1xf32>
    %207 = vector.broadcast %206 : vector<8x1xf32> to vector<8x24xf32>
    %208 = arith.subf %204, %207 : vector<8x24xf32>
    %209 = math.exp %208 : vector<8x24xf32>
    %cst_67 = arith.constant dense<0.000000e+00> : vector<8xf32>
    %210 = vector.multi_reduction <add>, %209, %cst_67 [1] : vector<8x24xf32> to vector<8xf32>
    %211 = vector.shape_cast %210 : vector<8xf32> to vector<8x1xf32>
    %212 = vector.broadcast %211 : vector<8x1xf32> to vector<8x24xf32>
    %213 = arith.divf %209, %212 : vector<8x24xf32>
    %cst_68 = arith.constant dense<0.000000e+00> : vector<8x8xf32>
    %214 = tpu.matmul %213, %202, %cst_68 {dimension_numbers = #tpu.dot_dimension_numbers<[1], [0], [0], [1], [0, 0, 1, 1], [], []>} : vector<8x24xf32>, vector<24x8xf32>, vector<8x8xf32> -> vector<8x8xf32>
    %215 = tpu.concatenate %184, %199, %214 in 1 : vector<8x8xf32>, vector<8x8xf32>, vector<8x8xf32> -> vector<8x24xf32>
    %216 = vector.extract_strided_slice %22 {offsets = [8, 0], sizes = [8, 24], strides = [1, 1]} : vector<24x24xf32> to vector<8x24xf32>
    %217 = vector.extract_strided_slice %8 {offsets = [32, 24], sizes = [8, 8], strides = [1, 1]} : vector<48x72xf32> to vector<8x8xf32>
    %218 = vector.extract_strided_slice %167 {offsets = [24, 0], sizes = [8, 24], strides = [1, 1]} : vector<72x24xf32> to vector<8x24xf32>
    %219 = vector.extract_strided_slice %168 {offsets = [0, 24], sizes = [24, 8], strides = [1, 1]} : vector<24x72xf32> to vector<24x8xf32>
    %cst_69 = arith.constant dense<0.000000e+00> : vector<8x24xf32>
    %220 = tpu.matmul %217, %218, %cst_69 {dimension_numbers = #tpu.dot_dimension_numbers<[1], [0], [0], [1], [0, 0, 1, 1], [], []>} : vector<8x8xf32>, vector<8x24xf32>, vector<8x24xf32> -> vector<8x24xf32>
    %221 = arith.addf %220, %216 : vector<8x24xf32>
    %cst_70 = arith.constant dense<0xFF800000> : vector<8xf32>
    %222 = vector.multi_reduction <maximumf>, %221, %cst_70 [1] : vector<8x24xf32> to vector<8xf32>
    %223 = vector.shape_cast %222 : vector<8xf32> to vector<8x1xf32>
    %224 = vector.broadcast %223 : vector<8x1xf32> to vector<8x24xf32>
    %225 = arith.subf %221, %224 : vector<8x24xf32>
    %226 = math.exp %225 : vector<8x24xf32>
    %cst_71 = arith.constant dense<0.000000e+00> : vector<8xf32>
    %227 = vector.multi_reduction <add>, %226, %cst_71 [1] : vector<8x24xf32> to vector<8xf32>
    %228 = vector.shape_cast %227 : vector<8xf32> to vector<8x1xf32>
    %229 = vector.broadcast %228 : vector<8x1xf32> to vector<8x24xf32>
    %230 = arith.divf %226, %229 : vector<8x24xf32>
    %cst_72 = arith.constant dense<0.000000e+00> : vector<8x8xf32>
    %231 = tpu.matmul %230, %219, %cst_72 {dimension_numbers = #tpu.dot_dimension_numbers<[1], [0], [0], [1], [0, 0, 1, 1], [], []>} : vector<8x24xf32>, vector<24x8xf32>, vector<8x8xf32> -> vector<8x8xf32>
    %232 = vector.extract_strided_slice %8 {offsets = [32, 32], sizes = [8, 8], strides = [1, 1]} : vector<48x72xf32> to vector<8x8xf32>
    %233 = vector.extract_strided_slice %167 {offsets = [32, 0], sizes = [8, 24], strides = [1, 1]} : vector<72x24xf32> to vector<8x24xf32>
    %234 = vector.extract_strided_slice %168 {offsets = [0, 32], sizes = [24, 8], strides = [1, 1]} : vector<24x72xf32> to vector<24x8xf32>
    %cst_73 = arith.constant dense<0.000000e+00> : vector<8x24xf32>
    %235 = tpu.matmul %232, %233, %cst_73 {dimension_numbers = #tpu.dot_dimension_numbers<[1], [0], [0], [1], [0, 0, 1, 1], [], []>} : vector<8x8xf32>, vector<8x24xf32>, vector<8x24xf32> -> vector<8x24xf32>
    %236 = arith.addf %235, %216 : vector<8x24xf32>
    %cst_74 = arith.constant dense<0xFF800000> : vector<8xf32>
    %237 = vector.multi_reduction <maximumf>, %236, %cst_74 [1] : vector<8x24xf32> to vector<8xf32>
    %238 = vector.shape_cast %237 : vector<8xf32> to vector<8x1xf32>
    %239 = vector.broadcast %238 : vector<8x1xf32> to vector<8x24xf32>
    %240 = arith.subf %236, %239 : vector<8x24xf32>
    %241 = math.exp %240 : vector<8x24xf32>
    %cst_75 = arith.constant dense<0.000000e+00> : vector<8xf32>
    %242 = vector.multi_reduction <add>, %241, %cst_75 [1] : vector<8x24xf32> to vector<8xf32>
    %243 = vector.shape_cast %242 : vector<8xf32> to vector<8x1xf32>
    %244 = vector.broadcast %243 : vector<8x1xf32> to vector<8x24xf32>
    %245 = arith.divf %241, %244 : vector<8x24xf32>
    %cst_76 = arith.constant dense<0.000000e+00> : vector<8x8xf32>
    %246 = tpu.matmul %245, %234, %cst_76 {dimension_numbers = #tpu.dot_dimension_numbers<[1], [0], [0], [1], [0, 0, 1, 1], [], []>} : vector<8x24xf32>, vector<24x8xf32>, vector<8x8xf32> -> vector<8x8xf32>
    %247 = vector.extract_strided_slice %8 {offsets = [32, 40], sizes = [8, 8], strides = [1, 1]} : vector<48x72xf32> to vector<8x8xf32>
    %248 = vector.extract_strided_slice %167 {offsets = [40, 0], sizes = [8, 24], strides = [1, 1]} : vector<72x24xf32> to vector<8x24xf32>
    %249 = vector.extract_strided_slice %168 {offsets = [0, 40], sizes = [24, 8], strides = [1, 1]} : vector<24x72xf32> to vector<24x8xf32>
    %cst_77 = arith.constant dense<0.000000e+00> : vector<8x24xf32>
    %250 = tpu.matmul %247, %248, %cst_77 {dimension_numbers = #tpu.dot_dimension_numbers<[1], [0], [0], [1], [0, 0, 1, 1], [], []>} : vector<8x8xf32>, vector<8x24xf32>, vector<8x24xf32> -> vector<8x24xf32>
    %251 = arith.addf %250, %216 : vector<8x24xf32>
    %cst_78 = arith.constant dense<0xFF800000> : vector<8xf32>
    %252 = vector.multi_reduction <maximumf>, %251, %cst_78 [1] : vector<8x24xf32> to vector<8xf32>
    %253 = vector.shape_cast %252 : vector<8xf32> to vector<8x1xf32>
    %254 = vector.broadcast %253 : vector<8x1xf32> to vector<8x24xf32>
    %255 = arith.subf %251, %254 : vector<8x24xf32>
    %256 = math.exp %255 : vector<8x24xf32>
    %cst_79 = arith.constant dense<0.000000e+00> : vector<8xf32>
    %257 = vector.multi_reduction <add>, %256, %cst_79 [1] : vector<8x24xf32> to vector<8xf32>
    %258 = vector.shape_cast %257 : vector<8xf32> to vector<8x1xf32>
    %259 = vector.broadcast %258 : vector<8x1xf32> to vector<8x24xf32>
    %260 = arith.divf %256, %259 : vector<8x24xf32>
    %cst_80 = arith.constant dense<0.000000e+00> : vector<8x8xf32>
    %261 = tpu.matmul %260, %249, %cst_80 {dimension_numbers = #tpu.dot_dimension_numbers<[1], [0], [0], [1], [0, 0, 1, 1], [], []>} : vector<8x24xf32>, vector<24x8xf32>, vector<8x8xf32> -> vector<8x8xf32>
    %262 = tpu.concatenate %231, %246, %261 in 1 : vector<8x8xf32>, vector<8x8xf32>, vector<8x8xf32> -> vector<8x24xf32>
    %263 = vector.extract_strided_slice %22 {offsets = [16, 0], sizes = [8, 24], strides = [1, 1]} : vector<24x24xf32> to vector<8x24xf32>
    %264 = vector.extract_strided_slice %8 {offsets = [40, 48], sizes = [8, 8], strides = [1, 1]} : vector<48x72xf32> to vector<8x8xf32>
    %265 = vector.extract_strided_slice %167 {offsets = [48, 0], sizes = [8, 24], strides = [1, 1]} : vector<72x24xf32> to vector<8x24xf32>
    %266 = vector.extract_strided_slice %168 {offsets = [0, 48], sizes = [24, 8], strides = [1, 1]} : vector<24x72xf32> to vector<24x8xf32>
    %cst_81 = arith.constant dense<0.000000e+00> : vector<8x24xf32>
    %267 = tpu.matmul %264, %265, %cst_81 {dimension_numbers = #tpu.dot_dimension_numbers<[1], [0], [0], [1], [0, 0, 1, 1], [], []>} : vector<8x8xf32>, vector<8x24xf32>, vector<8x24xf32> -> vector<8x24xf32>
    %268 = arith.addf %267, %263 : vector<8x24xf32>
    %cst_82 = arith.constant dense<0xFF800000> : vector<8xf32>
    %269 = vector.multi_reduction <maximumf>, %268, %cst_82 [1] : vector<8x24xf32> to vector<8xf32>
    %270 = vector.shape_cast %269 : vector<8xf32> to vector<8x1xf32>
    %271 = vector.broadcast %270 : vector<8x1xf32> to vector<8x24xf32>
    %272 = arith.subf %268, %271 : vector<8x24xf32>
    %273 = math.exp %272 : vector<8x24xf32>
    %cst_83 = arith.constant dense<0.000000e+00> : vector<8xf32>
    %274 = vector.multi_reduction <add>, %273, %cst_83 [1] : vector<8x24xf32> to vector<8xf32>
    %275 = vector.shape_cast %274 : vector<8xf32> to vector<8x1xf32>
    %276 = vector.broadcast %275 : vector<8x1xf32> to vector<8x24xf32>
    %277 = arith.divf %273, %276 : vector<8x24xf32>
    %cst_84 = arith.constant dense<0.000000e+00> : vector<8x8xf32>
    %278 = tpu.matmul %277, %266, %cst_84 {dimension_numbers = #tpu.dot_dimension_numbers<[1], [0], [0], [1], [0, 0, 1, 1], [], []>} : vector<8x24xf32>, vector<24x8xf32>, vector<8x8xf32> -> vector<8x8xf32>
    %279 = vector.extract_strided_slice %8 {offsets = [40, 56], sizes = [8, 8], strides = [1, 1]} : vector<48x72xf32> to vector<8x8xf32>
    %280 = vector.extract_strided_slice %167 {offsets = [56, 0], sizes = [8, 24], strides = [1, 1]} : vector<72x24xf32> to vector<8x24xf32>
    %281 = vector.extract_strided_slice %168 {offsets = [0, 56], sizes = [24, 8], strides = [1, 1]} : vector<24x72xf32> to vector<24x8xf32>
    %cst_85 = arith.constant dense<0.000000e+00> : vector<8x24xf32>
    %282 = tpu.matmul %279, %280, %cst_85 {dimension_numbers = #tpu.dot_dimension_numbers<[1], [0], [0], [1], [0, 0, 1, 1], [], []>} : vector<8x8xf32>, vector<8x24xf32>, vector<8x24xf32> -> vector<8x24xf32>
    %283 = arith.addf %282, %263 : vector<8x24xf32>
    %cst_86 = arith.constant dense<0xFF800000> : vector<8xf32>
    %284 = vector.multi_reduction <maximumf>, %283, %cst_86 [1] : vector<8x24xf32> to vector<8xf32>
    %285 = vector.shape_cast %284 : vector<8xf32> to vector<8x1xf32>
    %286 = vector.broadcast %285 : vector<8x1xf32> to vector<8x24xf32>
    %287 = arith.subf %283, %286 : vector<8x24xf32>
    %288 = math.exp %287 : vector<8x24xf32>
    %cst_87 = arith.constant dense<0.000000e+00> : vector<8xf32>
    %289 = vector.multi_reduction <add>, %288, %cst_87 [1] : vector<8x24xf32> to vector<8xf32>
    %290 = vector.shape_cast %289 : vector<8xf32> to vector<8x1xf32>
    %291 = vector.broadcast %290 : vector<8x1xf32> to vector<8x24xf32>
    %292 = arith.divf %288, %291 : vector<8x24xf32>
    %cst_88 = arith.constant dense<0.000000e+00> : vector<8x8xf32>
    %293 = tpu.matmul %292, %281, %cst_88 {dimension_numbers = #tpu.dot_dimension_numbers<[1], [0], [0], [1], [0, 0, 1, 1], [], []>} : vector<8x24xf32>, vector<24x8xf32>, vector<8x8xf32> -> vector<8x8xf32>
    %294 = vector.extract_strided_slice %8 {offsets = [40, 64], sizes = [8, 8], strides = [1, 1]} : vector<48x72xf32> to vector<8x8xf32>
    %295 = vector.extract_strided_slice %167 {offsets = [64, 0], sizes = [8, 24], strides = [1, 1]} : vector<72x24xf32> to vector<8x24xf32>
    %296 = vector.extract_strided_slice %168 {offsets = [0, 64], sizes = [24, 8], strides = [1, 1]} : vector<24x72xf32> to vector<24x8xf32>
    %cst_89 = arith.constant dense<0.000000e+00> : vector<8x24xf32>
    %297 = tpu.matmul %294, %295, %cst_89 {dimension_numbers = #tpu.dot_dimension_numbers<[1], [0], [0], [1], [0, 0, 1, 1], [], []>} : vector<8x8xf32>, vector<8x24xf32>, vector<8x24xf32> -> vector<8x24xf32>
    %298 = arith.addf %297, %263 : vector<8x24xf32>
    %cst_90 = arith.constant dense<0xFF800000> : vector<8xf32>
    %299 = vector.multi_reduction <maximumf>, %298, %cst_90 [1] : vector<8x24xf32> to vector<8xf32>
    %300 = vector.shape_cast %299 : vector<8xf32> to vector<8x1xf32>
    %301 = vector.broadcast %300 : vector<8x1xf32> to vector<8x24xf32>
    %302 = arith.subf %298, %301 : vector<8x24xf32>
    %303 = math.exp %302 : vector<8x24xf32>
    %cst_91 = arith.constant dense<0.000000e+00> : vector<8xf32>
    %304 = vector.multi_reduction <add>, %303, %cst_91 [1] : vector<8x24xf32> to vector<8xf32>
    %305 = vector.shape_cast %304 : vector<8xf32> to vector<8x1xf32>
    %306 = vector.broadcast %305 : vector<8x1xf32> to vector<8x24xf32>
    %307 = arith.divf %303, %306 : vector<8x24xf32>
    %cst_92 = arith.constant dense<0.000000e+00> : vector<8x8xf32>
    %308 = tpu.matmul %307, %296, %cst_92 {dimension_numbers = #tpu.dot_dimension_numbers<[1], [0], [0], [1], [0, 0, 1, 1], [], []>} : vector<8x24xf32>, vector<24x8xf32>, vector<8x8xf32> -> vector<8x8xf32>
    %309 = tpu.concatenate %278, %293, %308 in 1 : vector<8x8xf32>, vector<8x8xf32>, vector<8x8xf32> -> vector<8x24xf32>
    %310 = tpu.concatenate %215, %262, %309 in 1 : vector<8x24xf32>, vector<8x24xf32>, vector<8x24xf32> -> vector<8x72xf32>
    %311 = tpu.concatenate %166, %310 in 0 : vector<8x72xf32>, vector<8x72xf32> -> vector<16x72xf32>
    %c1_93 = arith.constant 1 : index
    %c0_94 = arith.constant 0 : index
    %c0_95 = arith.constant 0 : index
    %312 = vector.load %arg3[%c1_93, %c0_94, %c0_95] : memref<2x72x24xf32, #tpu.memory_space<vmem>>, vector<1x72x24xf32>
    %313 = vector.shape_cast %312 : vector<1x72x24xf32> to vector<72x24xf32>
    %cst_96 = arith.constant dense<0.000000e+00> : vector<16x24xf32>
    %314 = tpu.matmul %311, %313, %cst_96 {dimension_numbers = #tpu.dot_dimension_numbers<[1], [0], [0], [1], [0, 0, 1, 1], [], []>} : vector<16x72xf32>, vector<72x24xf32>, vector<16x24xf32> -> vector<16x24xf32>
    %c0_97 = arith.constant 0 : index
    %c0_98 = arith.constant 0 : index
    %315 = vector.load %arg6[%c0_97, %c0_98] : memref<16x16xf32, #tpu.memory_space<vmem>>, vector<16x16xf32>
    %cst_99 = arith.constant dense<0.000000e+00> : vector<16x24xf32>
    %316 = tpu.matmul %315, %314, %cst_99 {dimension_numbers = #tpu.dot_dimension_numbers<[1], [0], [0], [1], [0, 0, 1, 1], [], []>} : vector<16x16xf32>, vector<16x24xf32>, vector<16x24xf32> -> vector<16x24xf32>
    %c0_100 = arith.constant 0 : index
    %c0_101 = arith.constant 0 : index
    %317 = vector.load %arg7[%c0_100, %c0_101] : memref<16x24xf32, #tpu.memory_space<vmem>>, vector<16x24xf32>
    %318 = arith.addf %316, %317 : vector<16x24xf32>
    %c0_102 = arith.constant 0 : index
    %c0_103 = arith.constant 0 : index
    %319 = vector.load %arg8[%c0_102, %c0_103] : memref<16x24xf32, #tpu.memory_space<vmem>>, vector<16x24xf32>
    tpu.vector_store %arg8[%c0_102, %c0_103], %318 {strides = array<i32>} : memref<16x24xf32, #tpu.memory_space<vmem>>, vector<16x24xf32>,
    return
  }
}

</mosaic_0001>

<bundles_post_ra>
// kernel: tpu_custom_call.1
= control target key start
LH: loop header
LB: loop body
LE: loop exit
PB: predicated region body
PF: predicated region fallthrough
CT: control target
= control target key end

     0   :  { %vm46_vm0 = vcmask 195584   ;;  %v4480_v4 = vmov 0   ;;  %s5281_s0 = inlined_call_operand.vmem [shape: f32[48,24], index: 0, kind: input, shape index: {}]   ;;  %s5282_s1 = inlined_call_operand.vmem [shape: f32[2,24,72], index: 1, kind: input, shape index: {}]   ;;  %s5283_s2 = inlined_call_operand.vmem [shape: f32[2,1,72], index: 2, kind: input, shape index: {}]   ;;  %s5284_s3 = inlined_call_operand.vmem [shape: f32[2,72,24], index: 3, kind: input, shape index: {}]   ;;  %s5285_s4 = inlined_call_operand.vmem [shape: f32[72,1], index: 4, kind: input, shape index: {}]   ;;  %s5286_s5 = inlined_call_operand.vmem [shape: f32[24,24], index: 5, kind: input, shape index: {}]   ;;  %s5287_s6 = inlined_call_operand.vmem [shape: f32[16,16], index: 6, kind: input, shape index: {}]   ;;  %s5288_s7 = inlined_call_operand.vmem [shape: f32[16,24], index: 7, kind: input, shape index: {}]   ;;  %s5289_s8 = inlined_call_operand.hbm [shape: f32[16,24], index: 8, kind: output, shape index: {}]  }
   0x1   :  { %v38_v0 = vld [vmem:[%s5282_s1 + $0x10] sm:$0xff]  ;;  %v37_v1 = vld [vmem:[%s5282_s1 + $0x8] sm:$0xff]  ;;  %v30_v2 = vld [vmem:[%s5281_s0] sm:$0xff]  ;;  %4384 = vset.pattern.permute.xlu0 %v4480_v4 }
   0x2   :  { %4018 = vmatprep.subr.mxu0 %v38_v0  ;;  %v36_v3 = vld [vmem:[%s5282_s1] sm:$0xff]  ;;  %4024 = vmatprep.mubr.msk.f32.mxu0 %vm46_vm0, %v30_v2 }
   0x3   :  { %4019 = vmatpush3.msra.mxu0 %v38_v0  ;;  %v276_v5 = vld [vmem:[%s5285_s4] sm:$0xff] }
   0x4   :  { %4020 = vmatprep.subr.mxu0 %v37_v1 }
   0x5   :  { %13 = vsyncpa [#allocation3], 0  ;;  %4021 = vmatpush3.msra.mxu0 %v37_v1  ;;  %v31_v6 = vld [vmem:[%s5281_s0 + $0x8] sm:$0xff]  ;;  %287 = vperm.xlu0 %4384, %v276_v5   ;;  %v32_v8 = vld [vmem:[%s5281_s0 + $0x10] sm:$0xff]  ;;  %v4481_v9 = vmov 0.0   ;;  %vm4482_vm1 = vmmov 0  }
   0x6   :  { %4022 = vmatprep.subr.mxu0 %v36_v3  ;;  %v35_v7 = vld [vmem:[%s5281_s0 + $0x28] sm:$0xff]  ;;  %4039 = vmatprep.mubr.msk.f32.mxu1 %vm46_vm0, %v30_v2  ;;  %v34_v10 = vld [vmem:[%s5281_s0 + $0x20] sm:$0xff]  ;;  %v33_v11 = vld [vmem:[%s5281_s0 + $0x18] sm:$0xff]  ;;  %vm470_vm2 = vcmask 64512   ;;  %s4483_s20 = smov 120   ;;  %s4484_s26 = smov 112  }
   0x7   :  { %4023 = vmatpush3.msra.mxu0 %v36_v3  ;;  %4385 = vset.pattern.permute.xlu1 %v4480_v4  ;;  %v267_v12 = vld [vmem:[%s5284_s3] sm:$0xff]  ;;  %v3789_v13 = vld [vmem:[%s5282_s1 + $0x28] sm:$0xff]  ;;  %v3787_v15 = vld [vmem:[%s5282_s1 + $0x18] sm:$0xff]  ;;  %s4485_s29 = smov 104   ;;  %s4487_s16 = smov 88   ;;  %vm974_vm3 = vcmask 130048  }
   0x8   :  { %4025 = vmatmul.mubr.msk.f32.vlgmr.msra.gmra.mxu0 %vm46_vm0, %v31_v6  ;;  %4048 = vmatprep.subr.mxu0 %v4481_v9  ;;  %v3788_v14 = vld [vmem:[%s5282_s1 + $0x20] sm:$0xff]  ;;  %v268_v16 = vld [vmem:[%s5284_s3 + $0x8] sm:$0xff]  ;;  %v269_v17 = vld [vmem:[%s5284_s3 + $0x10] sm:$0xff]  ;;  %s4486_s1 = smov 96   ;;  %s4488_s0 = smov 72   ;;  %vm2009_vm4 = vcmask 392192  }
   0x9   :  { %4049 = vmatpush3.xpose.msk.msra.mxu0 %vm46_vm0, %v35_v7  ;;  %4027 = vmatprep.mubr.msk.f32.mxu0 %vm46_vm0, %v32_v8  ;;  %v3780_v18 = vld [vmem:[%s5283_s2] ss:$0 sm:$0xff]  ;;  %v4655_v37 = vld [vmem:[%s5283_s2 + $0x1] ss:$0 sm:$0xff]  ;;  %v277_v46 = vld [vmem:[%s5285_s4 + $0x8] sm:$0xff]  ;;  %s4489_s28 = smov 80  }
   0xa   :  { %4050 = vmatprep.subr.mxu0 %v4481_v9  ;;  %4033 = vmatprep.subr.mxu1 %v3789_v13  ;;  %v4686_v48 = vld [vmem:[%s5286_s5] sm:$0xff]  ;;  %v278_v57 = vld [vmem:[%s5285_s4 + $0x10] sm:$0xff]  ;;  %v270_v63 = vld [vmem:[%s5284_s3 + $0x18] sm:$0xff]  ;;  %s4493_s2 = smov 24   ;;  %s4494_s24 = smov 48   ;;  %vm3595_vm5 = vcmask 588800  }
   0xb   :  { %4034 = vmatpush3.msra.mxu1 %v3789_v13  ;;  %292 = vperm.xlu1 %4385, %v277_v46  }
   0xc   :  { %4028 = vmatmul.mubr.msk.f32.gmra.mxu0 %vm46_vm0, %v33_v11  ;;  %4035 = vmatprep.subr.mxu1 %v3788_v14 }
   0xd   :  { %4051 = vmatpush3.xpose.msk.msra.mxu0 %vm46_vm0, %v34_v10  ;;  %4030 = vmatprep.mubr.msk.f32.mxu0 %vm46_vm0, %v34_v10 }
   0xe   :  { %4052 = vmatprep.subr.mxu0 %v4481_v9  ;;  %4036 = vmatpush3.msra.mxu1 %v3788_v14 }
   0xf   :  { %4037 = vmatprep.subr.mxu1 %v3787_v15 }
  0x10   :  { %4031 = vmatmul.mubr.msk.f32.gmra.mxu0 %vm46_vm0, %v35_v7  ;;  %4038 = vmatpush3.msra.mxu1 %v3787_v15 }
  0x11   :  { %4053 = vmatpush3.xpose.msk.msra.mxu0 %vm46_vm0, %v33_v11  ;;  %4060 = vmatprep.mubr.msk.f32.mxu0 %vm4482_vm1, %v4481_v9 }
  0x12   :  { %4054 = vmatprep.subr.mxu0 %v4481_v9  ;;  %4040 = vmatmul.mubr.msk.f32.vlgmr.msra.gmra.mxu1 %vm46_vm0, %v31_v6 }
  0x13   :  { %4087 = vmatprep.subr.mxu1 %v4481_v9  ;;  %4042 = vmatprep.mubr.msk.f32.mxu1 %vm46_vm0, %v32_v8 }
  0x15   :  { %4055 = vmatpush3.xpose.msk.msra.mxu0 %vm46_vm0, %v32_v8 }
  0x16   :  { %4056 = vmatprep.subr.mxu0 %v4481_v9  ;;  %4043 = vmatmul.mubr.msk.f32.gmra.mxu1 %vm46_vm0, %v33_v11 }
  0x17   :  { %4045 = vmatprep.mubr.msk.f32.mxu1 %vm46_vm0, %v34_v10 }
  0x19   :  { %4057 = vmatpush3.xpose.msk.msra.mxu0 %vm46_vm0, %v31_v6 }
  0x1a   :  { %4058 = vmatprep.subr.mxu0 %v4481_v9  ;;  %4046 = vmatmul.mubr.msk.f32.gmra.mxu1 %vm46_vm0, %v35_v7 }
  0x1b   :  { %4089 = vmatprep.mubr.msk.f32.mxu1 %vm4482_vm1, %v4481_v9 }
  0x1d   :  { %4059 = vmatpush3.xpose.msk.msra.mxu0 %vm46_vm0, %v30_v2 }
  0x1e   :  { %4171 = vmatprep.subr.mxu0 %v4481_v9 }
  0x20   :  { %4061 = vmatmul.mubr.msk.f32.vlgmr.msra.gmra.mxu0 %vm46_vm0, %v267_v12 }
  0x21   :  { %4063 = vmatprep.mubr.msk.f32.mxu0 %vm4482_vm1, %v4481_v9 }
  0x24   :  { %4064 = vmatmul.mubr.msk.f32.gmra.mxu0 %vm46_vm0, %v268_v16  ;;  %v279_v16 = vld [vmem:[%s5285_s4 + $0x18] sm:$0xff] }
  0x25   :  { %4066 = vmatprep.mubr.msk.f32.mxu0 %vm4482_vm1, %v4481_v9 }
  0x28   :  { %4067 = vmatmul.mubr.msk.f32.gmra.mxu0 %vm46_vm0, %v269_v17 }
  0x29   :  { %4069 = vmatprep.mubr.msk.f32.mxu0 %vm4482_vm1, %v4481_v9 }
  0x2c   :  { %4070 = vmatmul.mubr.msk.f32.gmra.mxu0 %vm46_vm0, %v270_v63 }
  0x2d   :  { %4072 = vmatprep.mubr.msk.f32.mxu0 %vm4482_vm1, %v4481_v9 }
  0x80   :  { %v288_v30 = vpop.permute.xlu0 %287 }
  0x86   :  { %v293_v0 = vpop.permute.xlu1 %292 }
  0xc8   :  { %v4026_v19 = vpop.f32.mrf.mxu0 }
  0xc9   :  { %v4632_v20 = vadd.f32 %v4026_v19, %v3780_v18 }
  0xca   :  { %v131_v21 = vpop.f32.mrf.mxu0 }
  0xcb   :  { %v4644_v33 = vadd.f32 %v3780_v18, %v131_v21 }
  0xcc   :  { %v4029_v22 = vpop.f32.mrf.mxu0 }
  0xcd   :  { %v4634_v23 = vadd.f32 %v4029_v22, %v3780_v18 }
  0xce   :  { %v141_v24 = vpop.f32.mrf.mxu0 }
  0xcf   :  { %v4636_v25 = vadd.f32 %v3780_v18, %v141_v24 }
  0xd0   :  { %v4032_v26 = vpop.f32.mrf.mxu0 }
  0xd1   :  { %v4638_v27 = vadd.f32 %v4032_v26, %v3780_v18 }
  0xd2   :  { %v151_v28 = vpop.f32.mrf.mxu0  ;;  %v4041_v35 = vpop.f32.mrf.mxu1 }
  0xd3   :  { %v4640_v29 = vadd.f32 %v3780_v18, %v151_v28  ;;  %v4661_v41 = vadd.f32 %v4041_v35, %v4655_v37 }
  0xd4   :  { %v238_v36 = vpop.f32.mrf.mxu1 }
  0xd5   :  { %v4667_v44 = vadd.f32 %v4655_v37, %v238_v36  ;;  %v271_v36 = vld [vmem:[%s5284_s3 + $0x20] sm:$0xff] }
  0xd6   :  { %v4044_v38 = vpop.f32.mrf.mxu1  ;;  %4073 = vmatmul.mubr.msk.f32.gmra.mxu0 %vm46_vm0, %v271_v36 }
  0xd7   :  { %v4658_v39 = vadd.f32 %v4044_v38, %v4655_v37  ;;  %4075 = vmatprep.mubr.msk.f32.mxu0 %vm4482_vm1, %v4481_v9 }
  0xd8   :  { %v248_v40 = vpop.f32.mrf.mxu1 }
  0xd9   :  { %v4664_v42 = vadd.f32 %v4655_v37, %v248_v40 }
  0xda   :  { %v4047_v43 = vpop.f32.mrf.mxu1 }
  0xdb   :  { %v4670_v45 = vadd.f32 %v4047_v43, %v4655_v37 }
  0xdc   :  { %v4681_v47 = vpop.f32.mrf.mxu1 }
  0xe0   :  { %v423_v31 = vpop.f32.mrf.mxu0 }
  0xe1   :  { %v4642_v32 = vadd.f32 %v423_v31, %v288_v30 }
  0xe2   :  { %v4062_v34 = vpop.f32.mrf.mxu0 }
  0xe3   :  { %4088 = vmatpush3.msra.mxu1 %v4642_v32 }
  0xe4   :  { %4090 = vmatmul.mubr.msk.f32.vlgmr.msra.gmra.mxu1 %vm470_vm2, %v4644_v33  ;;  %4092 = vmatprep.subr.mxu1 %v4481_v9  ;;  %v428_v53 = vpop.f32.mrf.mxu0 }
  0xe5   :  { %4098 = vmatprep.mubr.msk.f32.mxu1 %vm4482_vm1, %v4481_v9  ;;  %4093 = vmatpush3.msra.mxu1 %v4664_v42  ;;  %v4706_v4 = vadd.f32 %v428_v53, %v293_v0 }
  0xe6   :  { %4094 = vmatprep.subr.mxu1 %v4481_v9  ;;  %v4065_v54 = vpop.f32.mrf.mxu0 }
  0xe7   :  { %4095 = vmatpush3.msra.mxu1 %v4661_v41 }
  0xe8   :  { %4096 = vmatprep.subr.mxu1 %v4481_v9  ;;  %v4690_v55 = vpop.f32.mrf.mxu0 }
  0xe9   :  { %4097 = vmatpush3.msra.mxu1 %v4667_v44 }
  0xea   :  { %4101 = vmatprep.subr.mxu1 %v4481_v9  ;;  %v4068_v56 = vpop.f32.mrf.mxu0 }
  0xec   :  { %v4721_v14 = vpop.f32.mrf.mxu0 }
  0xee   :  { %v4071_v15 = vpop.f32.mrf.mxu0 }
 0x1a4   :  { %v540_v49 = vpop.f32.mrf.mxu1 }
 0x1a5   :  { %v541_v50 = vadd.f32 %v540_v49, %v4686_v48 }
 0x1a6   :  { %v4091_v51 = vpop.f32.mrf.mxu1 }
 0x1a7   :  { %v544_v52 = vsel %vm46_vm0, %v541_v50, -inf }
 0x1a8   :  { %545 = vmax.xlane.f32.xlu0 %v544_v52 }
 0x1be   :  { %720 = vrot.lane.b32.xlu0 %v4664_v42, %s4483_s20 }
 0x1c2   :  { %297 = vperm.xlu0 %4384, %v278_v57  }
 0x231   :  { %v546_v58 = vpop.xlane.xlu0 %545 }
 0x232   :  { %v547_v59 = vsub.f32 %v541_v50, %v546_v58 }
 0x234   :  { %v548_v60 = vmul.f32 1.442695, %v547_v59  ;;  %v443_v59 = vpop.f32.mrf.mxu0 }
 0x235   :  { %v721_v6 = vpop.permute.xlu0 %720 }
 0x236   :  { %4386 = vpow2.f32 %v548_v60  ;;  %v4074_v60 = vpop.f32.mrf.mxu0 }
 0x23d   :  { %v298_v26 = vpop.permute.xlu0 %297 }
 0x23e   :  { %v4736_v35 = vadd.f32 %v4690_v55, %v298_v26 }
 0x243   :  { %v4387_v61 = vpop.eup %4386 }
 0x244   :  { %v550_v62 = vsel %vm46_vm0, %v4387_v61, 0.0 }
 0x245   :  { %551 = vadd.xlane.f32.xlu1 %v550_v62 }
 0x256   :  { %628 = vrot.lane.b32.xlu1 %v4644_v33, %s4483_s20 }
 0x2ce   :  { %v552_v1 = vpop.xlane.xlu1 %551 }
 0x2cf   :  { %4388 = vrcp.f32 %v552_v1 }
 0x2d2   :  { %v629_v5 = vpop.permute.xlu1 %628 }
 0x2dc   :  { %v4389_v2 = vpop.eup %4388 }
 0x2dd   :  { %v554_v3 = vmul.f32 %v4389_v2, %v4387_v61  ;;  %v280_v61 = vld [vmem:[%s5285_s4 + $0x20] sm:$0xff] }
 0x2df   :  { %4099 = vmatmul.mubr.msk.f32.vlgmr.msra.gmra.mxu1 %vm46_vm0, %v554_v3 }
 0x2e0   :  { %4102 = vmatpush3.msra.mxu1 %v4706_v4  ;;  %4103 = vmatprep.mubr.msk.f32.mxu1 %vm4482_vm1, %v4481_v9 }
 0x2e1   :  { %4106 = vmatprep.subr.mxu1 %v4481_v9 }
 0x2e3   :  { %4104 = vmatmul.mubr.msk.f32.vlgmr.msra.gmra.mxu1 %vm470_vm2, %v629_v5 }
 0x2e4   :  { %4107 = vmatpush3.msra.mxu1 %v721_v6  ;;  %4112 = vmatprep.mubr.msk.f32.mxu1 %vm4482_vm1, %v4481_v9 }
 0x2e5   :  { %4108 = vmatprep.subr.mxu1 %v4481_v9 }
 0x39f   :  { %v4717_v7 = vpop.f32.mrf.mxu1 }
 0x3a1   :  { %v4100_v8 = vpop.f32.mrf.mxu1 }
 0x3a2   :  { %v4787_v8 = vld [vmem:[%s5286_s5 + $0x8] sm:$0xff] }
 0x3a3   :  { %v698_v10 = vpop.f32.mrf.mxu1 }
 0x3a4   :  { %v699_v11 = vadd.f32 %v698_v10, %v4686_v48 }
 0x3a5   :  { %v4105_v12 = vpop.f32.mrf.mxu1 }
 0x3a6   :  { %v702_v13 = vsel %vm46_vm0, %v699_v11, -inf }
 0x3a7   :  { %703 = vmax.xlane.f32.xlu1 %v702_v13 }
 0x3b8   :  { %718 = vrot.lane.b32.xlu1 %v4661_v41, %s4483_s20 }
 0x3bc   :  { %302 = vperm.xlu1 %4385, %v279_v16  }
 0x430   :  { %v704_v17 = vpop.xlane.xlu1 %703 }
 0x431   :  { %v705_v18 = vsub.f32 %v699_v11, %v704_v17 }
 0x433   :  { %v706_v19 = vmul.f32 1.442695, %v705_v18 }
 0x434   :  { %v719_v21 = vpop.permute.xlu1 %718 }
 0x435   :  { %4390 = vpow2.f32 %v706_v19  ;;  %4109 = vmatpush3.msra.mxu1 %v719_v21 }
 0x436   :  { %4110 = vmatprep.subr.mxu1 %v4481_v9 }
 0x438   :  { %v303_v62 = vpop.permute.xlu1 %302 }
 0x439   :  { %v4772_v2 = vadd.f32 %v4721_v14, %v303_v62  ;;  %v274_v62 = vld [vmem:[%s5284_s3 + $0x38] sm:$0xff] }
 0x442   :  { %v4391_v22 = vpop.eup %4390 }
 0x443   :  { %v708_v24 = vsel %vm46_vm0, %v4391_v22, 0.0 }
 0x444   :  { %709 = vadd.xlane.f32.xlu0 %v708_v24 }
 0x45a   :  { %716 = vrot.lane.b32.xlu0 %v4667_v44, %s4483_s20 }
 0x45e   :  { %798 = vrot.lane.b32.xlu0 %v4644_v33, %s4484_s26 }
 0x4cd   :  { %v710_v28 = vpop.xlane.xlu0 %709 }
 0x4ce   :  { %4392 = vrcp.f32 %v710_v28 }
 0x4d1   :  { %v717_v30 = vpop.permute.xlu0 %716 }
 0x4d2   :  { %4111 = vmatpush3.msra.mxu1 %v717_v30 }
 0x4d3   :  { %4115 = vmatprep.subr.mxu1 %v4481_v9 }
 0x4d5   :  { %v799_v33 = vpop.permute.xlu0 %798 }
 0x4db   :  { %v4393_v31 = vpop.eup %4392 }
 0x4dc   :  { %v712_v34 = vmul.f32 %v4393_v31, %v4391_v22  ;;  %v272_v22 = vld [vmem:[%s5284_s3 + $0x28] sm:$0xff] }
 0x4dd   :  { %4076 = vmatmul.mubr.msk.f32.gmra.mxu0 %vm46_vm0, %v272_v22  ;;  %v282_v22 = vld [vmem:[%s5285_s4 + $0x30] sm:$0xff] }
 0x4de   :  { %4113 = vmatmul.mubr.msk.f32.vlgmr.msra.gmra.mxu1 %vm46_vm0, %v712_v34  ;;  %4078 = vmatprep.mubr.msk.f32.mxu0 %vm4482_vm1, %v4481_v9 }
 0x4df   :  { %4116 = vmatpush3.msra.mxu1 %v4736_v35  ;;  %4117 = vmatprep.mubr.msk.f32.mxu1 %vm4482_vm1, %v4481_v9 }
 0x4e0   :  { %4120 = vmatprep.subr.mxu1 %v4481_v9 }
 0x4e2   :  { %4118 = vmatmul.mubr.msk.f32.vlgmr.msra.gmra.mxu1 %vm470_vm2, %v799_v33 }
 0x4e3   :  { %4126 = vmatprep.mubr.msk.f32.mxu1 %vm4482_vm1, %v4481_v9 }
 0x59e   :  { %v4752_v38 = vpop.f32.mrf.mxu1 }
 0x5a0   :  { %v4114_v40 = vpop.f32.mrf.mxu1 }
 0x5a2   :  { %v868_v43 = vpop.f32.mrf.mxu1 }
 0x5a3   :  { %v869_v46 = vadd.f32 %v868_v43, %v4686_v48 }
 0x5a4   :  { %v4119_v49 = vpop.f32.mrf.mxu1 }
 0x5a5   :  { %v872_v50 = vsel %vm46_vm0, %v869_v46, -inf }
 0x5a6   :  { %873 = vmax.xlane.f32.xlu0 %v872_v50 }
 0x5bc   :  { %887 = vrot.lane.b32.xlu0 %v4664_v42, %s4484_s26 }
 0x5c0   :  { %885 = vrot.lane.b32.xlu0 %v4661_v41, %s4484_s26 }
 0x5c4   :  { %883 = vrot.lane.b32.xlu0 %v4667_v44, %s4484_s26 }
 0x62f   :  { %v874_v51 = vpop.xlane.xlu0 %873 }
 0x630   :  { %v875_v52 = vsub.f32 %v869_v46, %v874_v51 }
 0x632   :  { %v876_v53 = vmul.f32 1.442695, %v875_v52  ;;  %v281_v52 = vld [vmem:[%s5285_s4 + $0x28] sm:$0xff] }
 0x633   :  { %v888_v54 = vpop.permute.xlu0 %887 }
 0x634   :  { %4394 = vpow2.f32 %v876_v53  ;;  %4121 = vmatpush3.msra.mxu1 %v888_v54  ;;  %v448_v53 = vpop.f32.mrf.mxu0 }
 0x635   :  { %4122 = vmatprep.subr.mxu1 %v4481_v9 }
 0x636   :  { %v4077_v54 = vpop.f32.mrf.mxu0 }
 0x637   :  { %v886_v55 = vpop.permute.xlu0 %885 }
 0x638   :  { %4123 = vmatpush3.msra.mxu1 %v886_v55 }
 0x639   :  { %4124 = vmatprep.subr.mxu1 %v4481_v9 }
 0x63b   :  { %v884_v56 = vpop.permute.xlu0 %883 }
 0x63c   :  { %4125 = vmatpush3.msra.mxu1 %v884_v56 }
 0x63d   :  { %4129 = vmatprep.subr.mxu1 %v4481_v9 }
 0x641   :  { %v4395_v57 = vpop.eup %4394 }
 0x642   :  { %v878_v58 = vsel %vm46_vm0, %v4395_v57, 0.0 }
 0x643   :  { %879 = vadd.xlane.f32.xlu1 %v878_v58 }
 0x654   :  { %977 = vrot.lane.b32.xlu1 %v4632_v20, %s4485_s29 }
 0x658   :  { %307 = vperm.xlu1 %4385, %v280_v61  }
 0x6cc   :  { %v880_v63 = vpop.xlane.xlu1 %879 }
 0x6cd   :  { %4396 = vrcp.f32 %v880_v63 }
 0x6d0   :  { %v978_v3 = vpop.permute.xlu1 %977 }
 0x6d4   :  { %v308_v24 = vpop.permute.xlu1 %307 }
 0x6d5   :  { %v4811_v33 = vadd.f32 %v443_v59, %v308_v24 }
 0x6da   :  { %v4397_v0 = vpop.eup %4396 }
 0x6db   :  { %v882_v1 = vmul.f32 %v4397_v0, %v4395_v57 }
 0x6dd   :  { %4127 = vmatmul.mubr.msk.f32.vlgmr.msra.gmra.mxu1 %vm46_vm0, %v882_v1 }
 0x6de   :  { %4130 = vmatpush3.msra.mxu1 %v4772_v2  ;;  %4131 = vmatprep.mubr.msk.f32.mxu1 %vm4482_vm1, %v4481_v9 }
 0x6df   :  { %4134 = vmatprep.subr.mxu1 %v4481_v9 }
 0x6e1   :  { %4132 = vmatmul.mubr.msk.f32.vlgmr.msra.gmra.mxu1 %vm470_vm2, %v978_v3 }
 0x6e2   :  { %4140 = vmatprep.mubr.msk.f32.mxu1 %vm4482_vm1, %v4481_v9 }
 0x79d   :  { %v4782_v5 = vpop.f32.mrf.mxu1 }
 0x79f   :  { %v4128_v6 = vpop.f32.mrf.mxu1 }
 0x7a1   :  { %v1047_v10 = vpop.f32.mrf.mxu1 }
 0x7a2   :  { %v1048_v11 = vadd.f32 %v1047_v10, %v4787_v8 }
 0x7a3   :  { %v4133_v12 = vpop.f32.mrf.mxu1 }
 0x7a4   :  { %v1051_v13 = vsel %vm46_vm0, %v1048_v11, -inf }
 0x7a5   :  { %1052 = vmax.xlane.f32.xlu0 %v1051_v13 }
 0x7bb   :  { %1066 = vrot.lane.b32.xlu0 %v4664_v42, %s4485_s29 }
 0x7bf   :  { %1064 = vrot.lane.b32.xlu0 %v4661_v41, %s4485_s29 }
 0x7c3   :  { %1144 = vrot.lane.b32.xlu0 %v4632_v20, %s4486_s1 }
 0x7c7   :  { %1233 = vrot.lane.b32.xlu0 %v4664_v42, %s4486_s1 }
 0x82e   :  { %v1053_v14 = vpop.xlane.xlu0 %1052 }
 0x82f   :  { %v1054_v15 = vsub.f32 %v1048_v11, %v1053_v14 }
 0x831   :  { %v1055_v16 = vmul.f32 1.442695, %v1054_v15 }
 0x832   :  { %v1067_v17 = vpop.permute.xlu0 %1066 }
 0x833   :  { %4398 = vpow2.f32 %v1055_v16  ;;  %4135 = vmatpush3.msra.mxu1 %v1067_v17 }
 0x834   :  { %4136 = vmatprep.subr.mxu1 %v4481_v9 }
 0x836   :  { %v1065_v18 = vpop.permute.xlu0 %1064 }
 0x837   :  { %4137 = vmatpush3.msra.mxu1 %v1065_v18 }
 0x838   :  { %4138 = vmatprep.subr.mxu1 %v4481_v9 }
 0x83a   :  { %v1145_v31 = vpop.permute.xlu0 %1144 }
 0x83e   :  { %v1234_v36 = vpop.permute.xlu0 %1233 }
 0x840   :  { %v4399_v19 = vpop.eup %4398 }
 0x841   :  { %v1057_v21 = vsel %vm46_vm0, %v4399_v19, 0.0 }
 0x842   :  { %1058 = vadd.xlane.f32.xlu1 %v1057_v21 }
 0x853   :  { %1062 = vrot.lane.b32.xlu1 %v4667_v44, %s4485_s29 }
 0x8cb   :  { %v1059_v26 = vpop.xlane.xlu1 %1058 }
 0x8cc   :  { %4400 = vrcp.f32 %v1059_v26 }
 0x8cf   :  { %v1063_v28 = vpop.permute.xlu1 %1062 }
 0x8d0   :  { %4139 = vmatpush3.msra.mxu1 %v1063_v28  ;;  %v283_v28 = vld [vmem:[%s5285_s4 + $0x38] sm:$0xff] }
 0x8d1   :  { %4143 = vmatprep.subr.mxu1 %v4481_v9 }
 0x8d9   :  { %v4401_v30 = vpop.eup %4400 }
 0x8da   :  { %v1061_v34 = vmul.f32 %v4401_v30, %v4399_v19 }
 0x8dc   :  { %4141 = vmatmul.mubr.msk.f32.vlgmr.msra.gmra.mxu1 %vm46_vm0, %v1061_v34 }
 0x8dd   :  { %4144 = vmatpush3.msra.mxu1 %v4811_v33  ;;  %4145 = vmatprep.mubr.msk.f32.mxu1 %vm4482_vm1, %v4481_v9 }
 0x8de   :  { %4148 = vmatprep.subr.mxu1 %v4481_v9 }
 0x8e0   :  { %4146 = vmatmul.mubr.msk.f32.vlgmr.msra.gmra.mxu1 %vm470_vm2, %v1145_v31 }
 0x8e1   :  { %4149 = vmatpush3.msra.mxu1 %v1234_v36  ;;  %4154 = vmatprep.mubr.msk.f32.mxu1 %vm4482_vm1, %v4481_v9 }
 0x8e2   :  { %4150 = vmatprep.subr.mxu1 %v4481_v9 }
 0x99c   :  { %v4822_v40 = vpop.f32.mrf.mxu1 }
 0x99e   :  { %v4142_v43 = vpop.f32.mrf.mxu1 }
 0x9a0   :  { %v1214_v46 = vpop.f32.mrf.mxu1 }
 0x9a1   :  { %v1215_v49 = vadd.f32 %v1214_v46, %v4787_v8 }
 0x9a2   :  { %v4147_v50 = vpop.f32.mrf.mxu1 }
 0x9a3   :  { %v1218_v51 = vsel %vm46_vm0, %v1215_v49, -inf }
 0x9a4   :  { %1219 = vmax.xlane.f32.xlu1 %v1218_v51 }
 0x9b5   :  { %312 = vperm.xlu1 %4385, %v281_v52   ;;  %v275_v52 = vld [vmem:[%s5284_s3 + $0x40] sm:$0xff] }
 0x9b9   :  { %1231 = vrot.lane.b32.xlu1 %v4661_v41, %s4486_s1 }
 0x9bd   :  { %1311 = vrot.lane.b32.xlu1 %v4632_v20, %s4487_s16  ;;  %v273_v20 = vld [vmem:[%s5284_s3 + $0x30] sm:$0xff] }
 0x9be   :  { %4079 = vmatmul.mubr.msk.f32.gmra.mxu0 %vm46_vm0, %v273_v20 }
 0x9bf   :  { %4081 = vmatprep.mubr.msk.f32.mxu0 %vm4482_vm1, %v4481_v9 }
 0x9c1   :  { %1400 = vrot.lane.b32.xlu1 %v4664_v42, %s4487_s16 }
 0x9c2   :  { %4082 = vmatmul.mubr.msk.f32.gmra.mxu0 %vm46_vm0, %v274_v62 }
 0x9c3   :  { %4084 = vmatprep.mubr.msk.f32.mxu0 %vm4482_vm1, %v4481_v9 }
 0x9c5   :  { %1398 = vrot.lane.b32.xlu1 %v4661_v41, %s4487_s16 }
 0x9c6   :  { %4085 = vmatmul.mubr.msk.f32.gmra.mxu0 %vm46_vm0, %v275_v52 }
 0x9c7   :  { %4173 = vmatprep.mubr.msk.f32.mxu0 %vm4482_vm1, %v4481_v9 }
 0xa2d   :  { %v1220_v55 = vpop.xlane.xlu1 %1219 }
 0xa2e   :  { %v1221_v56 = vsub.f32 %v1215_v49, %v1220_v55 }
 0xa30   :  { %v1222_v57 = vmul.f32 1.442695, %v1221_v56 }
 0xa31   :  { %v313_v58 = vpop.permute.xlu1 %312 }
 0xa32   :  { %4402 = vpow2.f32 %v1222_v57  ;;  %v4854_v10 = vadd.f32 %v448_v53, %v313_v58 }
 0xa35   :  { %v1232_v59 = vpop.permute.xlu1 %1231 }
 0xa36   :  { %4151 = vmatpush3.msra.mxu1 %v1232_v59 }
 0xa37   :  { %4152 = vmatprep.subr.mxu1 %v4481_v9 }
 0xa39   :  { %v1312_v1 = vpop.permute.xlu1 %1311 }
 0xa3d   :  { %v1401_v11 = vpop.permute.xlu1 %1400 }
 0xa3f   :  { %v4403_v60 = vpop.eup %4402 }
 0xa40   :  { %v1224_v61 = vsel %vm46_vm0, %v4403_v60, 0.0 }
 0xa41   :  { %1225 = vadd.xlane.f32.xlu0 %v1224_v61  ;;  %v1399_v12 = vpop.permute.xlu1 %1398  ;;  %v4912_v61 = vld [vmem:[%s5286_s5 + $0x10] sm:$0xff]  ;;  %s4491_s5 = smov 16  }
 0xa57   :  { %1229 = vrot.lane.b32.xlu0 %v4667_v44, %s4486_s1 }
 0xa7e   :  { %v453_v19 = vpop.f32.mrf.mxu0 }
 0xa80   :  { %v4080_v21 = vpop.f32.mrf.mxu0 }
 0xa82   :  { %v458_v24 = vpop.f32.mrf.mxu0 }
 0xa84   :  { %v4083_v26 = vpop.f32.mrf.mxu0 }
 0xa86   :  { %v4907_v59 = vpop.f32.mrf.mxu0 }
 0xaca   :  { %v1226_v63 = vpop.xlane.xlu0 %1225 }
 0xacb   :  { %4404 = vrcp.f32 %v1226_v63 }
 0xace   :  { %v1230_v0 = vpop.permute.xlu0 %1229 }
 0xacf   :  { %4153 = vmatpush3.msra.mxu1 %v1230_v0 }
 0xad0   :  { %4157 = vmatprep.subr.mxu1 %v4481_v9 }
 0xad8   :  { %v4405_v3 = vpop.eup %4404 }
 0xad9   :  { %v1228_v6 = vmul.f32 %v4405_v3, %v4403_v60  ;;  %v4086_v60 = vpop.f32.mrf.mxu0 }
 0xada   :  { %v4966_v60 = vadd.f32 %v4655_v37, %v4681_v47 }
 0xadb   :  { %4155 = vmatmul.mubr.msk.f32.vlgmr.msra.gmra.mxu1 %vm46_vm0, %v1228_v6 }
 0xadc   :  { %4158 = vmatpush3.msra.mxu1 %v4854_v10  ;;  %4159 = vmatprep.mubr.msk.f32.mxu1 %vm4482_vm1, %v4481_v9 }
 0xadd   :  { %4162 = vmatprep.subr.mxu1 %v4481_v9 }
 0xadf   :  { %4160 = vmatmul.mubr.msk.f32.vlgmr.msra.gmra.mxu1 %vm470_vm2, %v1312_v1 }
 0xae0   :  { %4163 = vmatpush3.msra.mxu1 %v1401_v11  ;;  %4168 = vmatprep.mubr.msk.f32.mxu1 %vm4482_vm1, %v4481_v9 }
 0xae1   :  { %4164 = vmatprep.subr.mxu1 %v4481_v9 }
 0xae2   :  { %4165 = vmatpush3.msra.mxu1 %v1399_v12 }
 0xae3   :  { %4166 = vmatprep.subr.mxu1 %v4481_v9 }
 0xb9b   :  { %v4866_v13 = vpop.f32.mrf.mxu1 }
 0xb9d   :  { %v4156_v14 = vpop.f32.mrf.mxu1 }
 0xb9e   :  { %v284_v14 = vld [vmem:[%s5285_s4 + $0x40] sm:$0xff]  ;;  %s4490_s4 = smov 64  }
 0xb9f   :  { %v1381_v15 = vpop.f32.mrf.mxu1 }
 0xba0   :  { %v1382_v16 = vadd.f32 %v1381_v15, %v4787_v8 }
 0xba1   :  { %v4161_v17 = vpop.f32.mrf.mxu1 }
 0xba2   :  { %v1385_v18 = vsel %vm46_vm0, %v1382_v16, -inf }
 0xba3   :  { %1386 = vmax.xlane.f32.xlu0 %v1385_v18 }
 0xbb9   :  { %317 = vperm.xlu0 %4384, %v282_v22  }
 0xbbd   :  { %322 = vperm.xlu0 %4384, %v283_v28  }
 0xbc1   :  { %1396 = vrot.lane.b32.xlu0 %v4667_v44, %s4487_s16 }
 0xbc5   :  { %1656 = vrot.lane.b32.xlu0 %v4636_v25, %s4488_s0 }
 0xc2c   :  { %v1387_v30 = vpop.xlane.xlu0 %1386 }
 0xc2d   :  { %v1388_v31 = vsub.f32 %v1382_v16, %v1387_v30 }
 0xc2f   :  { %v1389_v34 = vmul.f32 1.442695, %v1388_v31 }
 0xc31   :  { %4406 = vpow2.f32 %v1389_v34 }
 0xc34   :  { %v318_v36 = vpop.permute.xlu0 %317 }
 0xc35   :  { %v4880_v43 = vadd.f32 %v453_v19, %v318_v36 }
 0xc37   :  { %4172 = vmatpush3.msra.mxu0 %v4880_v43 }
 0xc38   :  { %v323_v46 = vpop.permute.xlu0 %322  ;;  %4176 = vmatprep.subr.mxu0 %v4481_v9 }
 0xc39   :  { %v4897_v57 = vadd.f32 %v458_v24, %v323_v46 }
 0xc3c   :  { %v1397_v49 = vpop.permute.xlu0 %1396 }
 0xc3d   :  { %4167 = vmatpush3.msra.mxu1 %v1397_v49 }
 0xc3e   :  { %v4407_v50 = vpop.eup %4406  ;;  %4185 = vmatprep.subr.mxu1 %v4481_v9 }
 0xc3f   :  { %v1391_v51 = vsel %vm46_vm0, %v4407_v50, 0.0 }
 0xc40   :  { %1392 = vadd.xlane.f32.xlu1 %v1391_v51  ;;  %v1657_v58 = vpop.permute.xlu0 %1656 }
 0xc51   :  { %1489 = vrot.lane.b32.xlu1 %v4636_v25, %s4489_s28 }
 0xcc9   :  { %v1393_v53 = vpop.xlane.xlu1 %1392 }
 0xcca   :  { %4408 = vrcp.f32 %v1393_v53 }
 0xccd   :  { %v1490_v54 = vpop.permute.xlu1 %1489 }
 0xcce   :  { %4174 = vmatmul.mubr.msk.f32.vlgmr.msra.gmra.mxu0 %vm470_vm2, %v1490_v54 }
 0xccf   :  { %4182 = vmatprep.mubr.msk.f32.mxu0 %vm4482_vm1, %v4481_v9 }
 0xcd7   :  { %v4409_v55 = vpop.eup %4408 }
 0xcd8   :  { %v1395_v56 = vmul.f32 %v4409_v55, %v4407_v50 }
 0xcda   :  { %4169 = vmatmul.mubr.msk.f32.vlgmr.msra.gmra.mxu1 %vm46_vm0, %v1395_v56 }
 0xcdb   :  { %4186 = vmatpush3.msra.mxu1 %v4897_v57  ;;  %4187 = vmatprep.mubr.msk.f32.mxu1 %vm4482_vm1, %v4481_v9 }
 0xcdc   :  { %4190 = vmatprep.subr.mxu1 %v4481_v9 }
 0xcde   :  { %4188 = vmatmul.mubr.msk.f32.vlgmr.msra.gmra.mxu1 %vm470_vm2, %v1657_v58 }
 0xcdf   :  { %4196 = vmatprep.mubr.msk.f32.mxu1 %vm4482_vm1, %v4481_v9 }
 0xd8e   :  { %v1559_v20 = vpop.f32.mrf.mxu0 }
 0xd8f   :  { %v1560_v62 = vadd.f32 %v1559_v20, %v4912_v61 }
 0xd90   :  { %v4175_v63 = vpop.f32.mrf.mxu0 }
 0xd91   :  { %v1563_v0 = vsel %vm46_vm0, %v1560_v62, -inf }
 0xd92   :  { %1564 = vmax.xlane.f32.xlu1 %v1563_v0 }
 0xd9a   :  { %v4916_v1 = vpop.f32.mrf.mxu1 }
 0xd9c   :  { %v4170_v3 = vpop.f32.mrf.mxu1 }
 0xd9e   :  { %v1726_v6 = vpop.f32.mrf.mxu1 }
 0xd9f   :  { %v1727_v11 = vadd.f32 %v1726_v6, %v4912_v61 }
 0xda0   :  { %v4189_v12 = vpop.f32.mrf.mxu1 }
 0xda1   :  { %v1730_v15 = vsel %vm46_vm0, %v1727_v11, -inf }
 0xda2   :  { %1731 = vmax.xlane.f32.xlu0 %v1730_v15 }
 0xda3   :  { %327 = vperm.xlu1 %4385, %v284_v14  }
 0xda7   :  { %1745 = vrot.lane.b32.xlu1 %v4664_v42, %s4488_s0 }
 0xdab   :  { %1743 = vrot.lane.b32.xlu1 %v4661_v41, %s4488_s0 }
 0xdaf   :  { %1741 = vrot.lane.b32.xlu1 %v4667_v44, %s4488_s0 }
 0xe1b   :  { %v1565_v16 = vpop.xlane.xlu1 %1564 }
 0xe1c   :  { %v1566_v17 = vsub.f32 %v1560_v62, %v1565_v16 }
 0xe1e   :  { %v1567_v18 = vmul.f32 1.442695, %v1566_v17 }
 0xe1f   :  { %v328_v19 = vpop.permute.xlu1 %327 }
 0xe20   :  { %4410 = vpow2.f32 %v1567_v18  ;;  %v4948_v54 = vadd.f32 %v4907_v59, %v328_v19 }
 0xe23   :  { %v1746_v21 = vpop.permute.xlu1 %1745 }
 0xe24   :  { %4191 = vmatpush3.msra.mxu1 %v1746_v21 }
 0xe25   :  { %4192 = vmatprep.subr.mxu1 %v4481_v9 }
 0xe27   :  { %v1744_v22 = vpop.permute.xlu1 %1743 }
 0xe28   :  { %4193 = vmatpush3.msra.mxu1 %v1744_v22 }
 0xe29   :  { %4194 = vmatprep.subr.mxu1 %v4481_v9 }
 0xe2b   :  { %v1742_v24 = vpop.permute.xlu1 %1741  ;;  %v1732_v26 = vpop.xlane.xlu0 %1731 }
 0xe2c   :  { %v1733_v28 = vsub.f32 %v1727_v11, %v1732_v26  ;;  %4195 = vmatpush3.msra.mxu1 %v1742_v24 }
 0xe2d   :  { %v4411_v30 = vpop.eup %4410  ;;  %4213 = vmatprep.subr.mxu1 %v4481_v9 }
 0xe2e   :  { %v1734_v31 = vmul.f32 1.442695, %v1733_v28  ;;  %v1569_v34 = vsel %vm46_vm0, %v4411_v30, 0.0 }
 0xe2f   :  { %1570 = vadd.xlane.f32.xlu0 %v1569_v34 }
 0xe30   :  { %4412 = vpow2.f32 %v1734_v31 }
 0xe3d   :  { %v4413_v36 = vpop.eup %4412 }
 0xe3e   :  { %v1736_v46 = vsel %vm46_vm0, %v4413_v36, 0.0 }
 0xe3f   :  { %1737 = vadd.xlane.f32.xlu1 %v1736_v46 }
 0xe45   :  { %1578 = vrot.lane.b32.xlu0 %v4664_v42, %s4489_s28 }
 0xe49   :  { %1576 = vrot.lane.b32.xlu0 %v4661_v41, %s4489_s28 }
 0xe4d   :  { %1574 = vrot.lane.b32.xlu0 %v4667_v44, %s4489_s28 }
 0xe50   :  { %2012 = vrot.lane.b32.xlu1 %v4642_v32, %s4485_s29 }
 0xe51   :  { %1823 = vrot.lane.b32.xlu0 %v4636_v25, %s4490_s4 }
 0xeb8   :  { %v1571_v49 = vpop.xlane.xlu0 %1570 }
 0xeb9   :  { %4414 = vrcp.f32 %v1571_v49 }
 0xebc   :  { %v1579_v50 = vpop.permute.xlu0 %1578 }
 0xebd   :  { %4177 = vmatpush3.msra.mxu0 %v1579_v50 }
 0xebe   :  { %4178 = vmatprep.subr.mxu0 %v4481_v9 }
 0xec0   :  { %v1577_v51 = vpop.permute.xlu0 %1576 }
 0xec1   :  { %4179 = vmatpush3.msra.mxu0 %v1577_v51 }
 0xec2   :  { %4180 = vmatprep.subr.mxu0 %v4481_v9 }
 0xec4   :  { %v1575_v52 = vpop.permute.xlu0 %1574 }
 0xec5   :  { %4181 = vmatpush3.msra.mxu0 %v1575_v52 }
 0xec6   :  { %v4415_v53 = vpop.eup %4414  ;;  %4199 = vmatprep.subr.mxu0 %v4481_v9 }
 0xec7   :  { %v1573_v32 = vmul.f32 %v4415_v53, %v4411_v30 }
 0xec8   :  { %v1738_v25 = vpop.xlane.xlu1 %1737  ;;  %v1824_v55 = vpop.permute.xlu0 %1823 }
 0xec9   :  { %4416 = vrcp.f32 %v1738_v25  ;;  %4183 = vmatmul.mubr.msk.f32.vlgmr.msra.gmra.mxu0 %vm46_vm0, %v1573_v32 }
 0xeca   :  { %4200 = vmatpush3.msra.mxu0 %v4948_v54  ;;  %4201 = vmatprep.mubr.msk.f32.mxu0 %vm4482_vm1, %v4481_v9 }
 0xecb   :  { %4204 = vmatprep.subr.mxu0 %v4481_v9 }
 0xecc   :  { %v2013_v59 = vpop.permute.xlu1 %2012 }
 0xecd   :  { %4202 = vmatmul.mubr.msk.f32.vlgmr.msra.gmra.mxu0 %vm470_vm2, %v1824_v55 }
 0xece   :  { %4210 = vmatprep.mubr.msk.f32.mxu0 %vm4482_vm1, %v4481_v9 }
 0xed6   :  { %v4417_v56 = vpop.eup %4416 }
 0xed7   :  { %v1740_v58 = vmul.f32 %v4417_v56, %v4413_v36 }
 0xed9   :  { %4197 = vmatmul.mubr.msk.f32.vlgmr.msra.gmra.mxu1 %vm46_vm0, %v1740_v58 }
 0xeda   :  { %4214 = vmatpush3.msra.mxu1 %v2013_v59  ;;  %4215 = vmatprep.mubr.msk.f32.mxu1 %vm4482_vm1, %v4481_v9 }
 0xedb   :  { %4218 = vmatprep.subr.mxu1 %v4481_v9 }
 0xedd   :  { %4216 = vmatmul.mubr.msk.f32.vlgmr.msra.gmra.mxu1 %vm470_vm2, %v4634_v23 }
 0xede   :  { %4219 = vmatpush3.msra.mxu1 %v4670_v45  ;;  %4224 = vmatprep.mubr.msk.f32.mxu1 %vm4482_vm1, %v4481_v9 }
 0xedf   :  { %4220 = vmatprep.subr.mxu1 %v4481_v9 }
 0xee0   :  { %4221 = vmatpush3.msra.mxu1 %v4966_v60 }
 0xee1   :  { %4222 = vmatprep.subr.mxu1 %v4481_v9 }
 0xee2   :  { %4223 = vmatpush3.msra.mxu1 %v4658_v39 }
 0xee3   :  { %4241 = vmatprep.subr.mxu1 %v4481_v9 }
 0xf89   :  { %v4976_v20 = vpop.f32.mrf.mxu0 }
 0xf8b   :  { %v4184_v62 = vpop.f32.mrf.mxu0 }
 0xf8d   :  { %v1893_v37 = vpop.f32.mrf.mxu0 }
 0xf8e   :  { %v1894_v47 = vadd.f32 %v1893_v37, %v4912_v61 }
 0xf8f   :  { %v4203_v63 = vpop.f32.mrf.mxu0 }
 0xf90   :  { %v1897_v0 = vsel %vm46_vm0, %v1894_v47, -inf }
 0xf91   :  { %1898 = vmax.xlane.f32.xlu0 %v1897_v0 }
 0xf99   :  { %v4980_v3 = vpop.f32.mrf.mxu1 }
 0xf9b   :  { %v4198_v6 = vpop.f32.mrf.mxu1 }
 0xf9d   :  { %v2084_v11 = vpop.f32.mrf.mxu1 }
 0xf9e   :  { %v2085_v12 = vadd.f32 %v2084_v11, %v4686_v48 }
 0xf9f   :  { %v4217_v14 = vpop.f32.mrf.mxu1 }
 0xfa0   :  { %v2088_v15 = vsel %vm46_vm0, %v2085_v12, -inf }
 0xfa1   :  { %2089 = vmax.xlane.f32.xlu1 %v2088_v15 }
 0xfb2   :  { %1912 = vrot.lane.b32.xlu1 %v4664_v42, %s4490_s4 }
 0xfb6   :  { %1908 = vrot.lane.b32.xlu1 %v4667_v44, %s4490_s4 }
 0xfba   :  { %2175 = vrot.lane.b32.xlu1 %v4706_v4, %s4485_s29 }
 0xfbe   :  { %2349 = vrot.lane.b32.xlu1 %v4736_v35, %s4485_s29 }
0x101a   :  { %v1899_v16 = vpop.xlane.xlu0 %1898 }
0x101b   :  { %v1900_v17 = vsub.f32 %v1894_v47, %v1899_v16 }
0x101d   :  { %v1901_v18 = vmul.f32 1.442695, %v1900_v17 }
0x101f   :  { %4418 = vpow2.f32 %v1901_v18 }
0x102a   :  { %v2090_v19 = vpop.xlane.xlu1 %2089 }
0x102b   :  { %v2091_v42 = vsub.f32 %v2085_v12, %v2090_v19 }
0x102c   :  { %v4419_v21 = vpop.eup %4418 }
0x102d   :  { %v1903_v22 = vsel %vm46_vm0, %v4419_v21, 0.0  ;;  %v2092_v44 = vmul.f32 1.442695, %v2091_v42 }
0x102e   :  { %1904 = vadd.xlane.f32.xlu0 %v1903_v22  ;;  %v1913_v24 = vpop.permute.xlu1 %1912 }
0x102f   :  { %4205 = vmatpush3.msra.mxu0 %v1913_v24  ;;  %4420 = vpow2.f32 %v2092_v44 }
0x1030   :  { %4206 = vmatprep.subr.mxu0 %v4481_v9 }
0x1032   :  { %v1909_v30 = vpop.permute.xlu1 %1908 }
0x1036   :  { %v2176_v34 = vpop.permute.xlu1 %2175 }
0x103a   :  { %v2350_v50 = vpop.permute.xlu1 %2349 }
0x103c   :  { %v4421_v4 = vpop.eup %4420 }
0x103d   :  { %v2094_v35 = vsel %vm46_vm0, %v4421_v4, 0.0 }
0x1044   :  { %1910 = vrot.lane.b32.xlu0 %v4661_v41, %s4490_s4 }
0x1063   :  { %2095 = vadd.xlane.f32.xlu0 %v2094_v35 }
0x1079   :  { %2172 = vrot.lane.b32.xlu0 %v4634_v23, %s4483_s20 }
0x107d   :  { %2346 = vrot.lane.b32.xlu0 %v4634_v23, %s4484_s26 }
0x10b7   :  { %v1905_v26 = vpop.xlane.xlu0 %1904 }
0x10b8   :  { %4422 = vrcp.f32 %v1905_v26 }
0x10bb   :  { %v1911_v28 = vpop.permute.xlu0 %1910 }
0x10bc   :  { %4207 = vmatpush3.msra.mxu0 %v1911_v28 }
0x10bd   :  { %4208 = vmatprep.subr.mxu0 %v4481_v9 }
0x10be   :  { %4209 = vmatpush3.msra.mxu0 %v1909_v30 }
0x10bf   :  { %4227 = vmatprep.subr.mxu0 %v4481_v9 }
0x10c5   :  { %v4423_v41 = vpop.eup %4422 }
0x10c6   :  { %v1907_v31 = vmul.f32 %v4423_v41, %v4419_v21 }
0x10c8   :  { %4211 = vmatmul.mubr.msk.f32.vlgmr.msra.gmra.mxu0 %vm46_vm0, %v1907_v31 }
0x10c9   :  { %4228 = vmatpush3.msra.mxu0 %v2176_v34  ;;  %4229 = vmatprep.mubr.msk.f32.mxu0 %vm4482_vm1, %v4481_v9 }
0x10ca   :  { %4232 = vmatprep.subr.mxu0 %v4481_v9 }
0x10ec   :  { %v2096_v23 = vpop.xlane.xlu0 %2095 }
0x10ed   :  { %4424 = vrcp.f32 %v2096_v23 }
0x10f0   :  { %v2173_v36 = vpop.permute.xlu0 %2172 }
0x10f1   :  { %4230 = vmatmul.mubr.msk.f32.vlgmr.msra.gmra.mxu0 %vm470_vm2, %v2173_v36 }
0x10f2   :  { %4238 = vmatprep.mubr.msk.f32.mxu0 %vm4482_vm1, %v4481_v9 }
0x10f4   :  { %v2347_v51 = vpop.permute.xlu0 %2346 }
0x10fa   :  { %v4425_v46 = vpop.eup %4424 }
0x10fb   :  { %v2098_v49 = vmul.f32 %v4425_v46, %v4421_v4 }
0x10fd   :  { %4225 = vmatmul.mubr.msk.f32.vlgmr.msra.gmra.mxu1 %vm46_vm0, %v2098_v49 }
0x10fe   :  { %4242 = vmatpush3.msra.mxu1 %v2350_v50  ;;  %4243 = vmatprep.mubr.msk.f32.mxu1 %vm4482_vm1, %v4481_v9 }
0x10ff   :  { %4246 = vmatprep.subr.mxu1 %v4481_v9 }
0x1101   :  { %4244 = vmatmul.mubr.msk.f32.vlgmr.msra.gmra.mxu1 %vm470_vm2, %v2347_v51 }
0x1102   :  { %4252 = vmatprep.mubr.msk.f32.mxu1 %vm4482_vm1, %v4481_v9 }
0x1188   :  { %v5017_v52 = vpop.f32.mrf.mxu0 }
0x118a   :  { %v4212_v53 = vpop.f32.mrf.mxu0 }
0x11b1   :  { %v2246_v32 = vpop.f32.mrf.mxu0 }
0x11b2   :  { %v2247_v25 = vadd.f32 %v2246_v32, %v4686_v48 }
0x11b3   :  { %v4231_v55 = vpop.f32.mrf.mxu0 }
0x11b4   :  { %v2250_v56 = vsel %vm46_vm0, %v2247_v25, -inf }
0x11b5   :  { %2251 = vmax.xlane.f32.xlu1 %v2250_v56 }
0x11bd   :  { %v5021_v58 = vpop.f32.mrf.mxu1 }
0x11bf   :  { %v4226_v59 = vpop.f32.mrf.mxu1 }
0x11c1   :  { %v2420_v62 = vpop.f32.mrf.mxu1 }
0x11c2   :  { %v2421_v37 = vadd.f32 %v2420_v62, %v4686_v48 }
0x11c3   :  { %v4245_v47 = vpop.f32.mrf.mxu1 }
0x11c4   :  { %v2424_v63 = vsel %vm46_vm0, %v2421_v37, -inf }
0x11c5   :  { %2425 = vmax.xlane.f32.xlu0 %v2424_v63 }
0x11c6   :  { %2439 = vrot.lane.b32.xlu1 %v4670_v45, %s4484_s26 }
0x11ca   :  { %2266 = vrot.lane.b32.xlu1 %v4966_v60, %s4483_s20 }
0x11ce   :  { %2264 = vrot.lane.b32.xlu1 %v4658_v39, %s4483_s20 }
0x11d2   :  { %2531 = vrot.lane.b32.xlu1 %v4772_v2, %s4485_s29 }
0x123e   :  { %v2252_v0 = vpop.xlane.xlu1 %2251 }
0x123f   :  { %v2253_v6 = vsub.f32 %v2247_v25, %v2252_v0 }
0x1241   :  { %v2254_v11 = vmul.f32 1.442695, %v2253_v6 }
0x1242   :  { %v2440_v48 = vpop.permute.xlu1 %2439 }
0x1243   :  { %4426 = vpow2.f32 %v2254_v11  ;;  %4247 = vmatpush3.msra.mxu1 %v2440_v48 }
0x1244   :  { %4248 = vmatprep.subr.mxu1 %v4481_v9 }
0x1246   :  { %v2267_v2 = vpop.permute.xlu1 %2266 }
0x124a   :  { %v2265_v24 = vpop.permute.xlu1 %2264 }
0x124e   :  { %v2426_v12 = vpop.xlane.xlu0 %2425 }
0x124f   :  { %v2427_v14 = vsub.f32 %v2421_v37, %v2426_v12 }
0x1250   :  { %v4427_v15 = vpop.eup %4426 }
0x1251   :  { %v2428_v16 = vmul.f32 1.442695, %v2427_v14  ;;  %v2256_v17 = vsel %vm46_vm0, %v4427_v15, 0.0 }
0x1252   :  { %2257 = vadd.xlane.f32.xlu0 %v2256_v17 }
0x1253   :  { %4428 = vpow2.f32 %v2428_v16 }
0x1260   :  { %v4429_v18 = vpop.eup %4428 }
0x1261   :  { %v2430_v19 = vsel %vm46_vm0, %v4429_v18, 0.0 }
0x1262   :  { %2431 = vadd.xlane.f32.xlu1 %v2430_v19 }
0x1268   :  { %2268 = vrot.lane.b32.xlu0 %v4670_v45, %s4483_s20  ;;  %s4492_s20 = smov 8  }
0x126c   :  { %2437 = vrot.lane.b32.xlu0 %v4966_v60, %s4484_s26 }
0x1270   :  { %2435 = vrot.lane.b32.xlu0 %v4658_v39, %s4484_s26 }
0x1273   :  { %2702 = vrot.lane.b32.xlu1 %v4811_v33, %s4485_s29  ;;  %v2532_v33 = vpop.permute.xlu1 %2531 }
0x1274   :  { %2528 = vrot.lane.b32.xlu0 %v4640_v29, %s4485_s29 }
0x1278   :  { %2699 = vrot.lane.b32.xlu0 %v4640_v29, %s4486_s1 }
0x12db   :  { %v2258_v21 = vpop.xlane.xlu0 %2257 }
0x12dc   :  { %4430 = vrcp.f32 %v2258_v21 }
0x12df   :  { %v2269_v22 = vpop.permute.xlu0 %2268 }
0x12e0   :  { %4233 = vmatpush3.msra.mxu0 %v2269_v22 }
0x12e1   :  { %4234 = vmatprep.subr.mxu0 %v4481_v9 }
0x12e2   :  { %4235 = vmatpush3.msra.mxu0 %v2267_v2 }
0x12e3   :  { %4236 = vmatprep.subr.mxu0 %v4481_v9  ;;  %v2438_v42 = vpop.permute.xlu0 %2437 }
0x12e4   :  { %4237 = vmatpush3.msra.mxu0 %v2265_v24  ;;  %4249 = vmatpush3.msra.mxu1 %v2438_v42 }
0x12e5   :  { %4250 = vmatprep.subr.mxu1 %v4481_v9  ;;  %4255 = vmatprep.subr.mxu0 %v4481_v9 }
0x12e7   :  { %v2436_v44 = vpop.permute.xlu0 %2435 }
0x12e8   :  { %4251 = vmatpush3.msra.mxu1 %v2436_v44 }
0x12e9   :  { %v4431_v4 = vpop.eup %4430  ;;  %4269 = vmatprep.subr.mxu1 %v4481_v9 }
0x12ea   :  { %v2260_v35 = vmul.f32 %v4431_v4, %v4427_v15 }
0x12eb   :  { %v2432_v26 = vpop.xlane.xlu1 %2431  ;;  %v2529_v28 = vpop.permute.xlu0 %2528 }
0x12ec   :  { %4432 = vrcp.f32 %v2432_v26  ;;  %4239 = vmatmul.mubr.msk.f32.vlgmr.msra.gmra.mxu0 %vm46_vm0, %v2260_v35 }
0x12ed   :  { %4256 = vmatpush3.msra.mxu0 %v2532_v33  ;;  %4257 = vmatprep.mubr.msk.f32.mxu0 %vm4482_vm1, %v4481_v9 }
0x12ee   :  { %4260 = vmatprep.subr.mxu0 %v4481_v9 }
0x12ef   :  { %v2703_v31 = vpop.permute.xlu1 %2702  ;;  %v2700_v34 = vpop.permute.xlu0 %2699 }
0x12f0   :  { %4258 = vmatmul.mubr.msk.f32.vlgmr.msra.gmra.mxu0 %vm470_vm2, %v2529_v28 }
0x12f1   :  { %4266 = vmatprep.mubr.msk.f32.mxu0 %vm4482_vm1, %v4481_v9 }
0x12f9   :  { %v4433_v30 = vpop.eup %4432 }
0x12fa   :  { %v2434_v41 = vmul.f32 %v4433_v30, %v4429_v18 }
0x12fc   :  { %4253 = vmatmul.mubr.msk.f32.vlgmr.msra.gmra.mxu1 %vm46_vm0, %v2434_v41 }
0x12fd   :  { %4270 = vmatpush3.msra.mxu1 %v2703_v31  ;;  %4271 = vmatprep.mubr.msk.f32.mxu1 %vm4482_vm1, %v4481_v9 }
0x12fe   :  { %4274 = vmatprep.subr.mxu1 %v4481_v9 }
0x1300   :  { %4272 = vmatmul.mubr.msk.f32.vlgmr.msra.gmra.mxu1 %vm470_vm2, %v2700_v34 }
0x1301   :  { %4280 = vmatprep.mubr.msk.f32.mxu1 %vm4482_vm1, %v4481_v9 }
0x13ac   :  { %v5067_v23 = vpop.f32.mrf.mxu0 }
0x13ae   :  { %v4240_v36 = vpop.f32.mrf.mxu0 }
0x13b0   :  { %v2602_v46 = vpop.f32.mrf.mxu0 }
0x13b1   :  { %v2603_v49 = vadd.f32 %v2602_v46, %v4787_v8 }
0x13b2   :  { %v4259_v50 = vpop.f32.mrf.mxu0 }
0x13b3   :  { %v2606_v51 = vsel %vm46_vm0, %v2603_v49, -inf }
0x13b4   :  { %2607 = vmax.xlane.f32.xlu1 %v2606_v51 }
0x13bc   :  { %v5071_v53 = vpop.f32.mrf.mxu1 }
0x13be   :  { %v4254_v32 = vpop.f32.mrf.mxu1 }
0x13c0   :  { %v2773_v25 = vpop.f32.mrf.mxu1 }
0x13c1   :  { %v2774_v55 = vadd.f32 %v2773_v25, %v4787_v8 }
0x13c2   :  { %v4273_v56 = vpop.f32.mrf.mxu1 }
0x13c3   :  { %v2777_v59 = vsel %vm46_vm0, %v2774_v55, -inf }
0x13c4   :  { %2778 = vmax.xlane.f32.xlu0 %v2777_v59 }
0x13c5   :  { %2792 = vrot.lane.b32.xlu1 %v4670_v45, %s4486_s1 }
0x13c9   :  { %2619 = vrot.lane.b32.xlu1 %v4966_v60, %s4485_s29 }
0x13cd   :  { %2617 = vrot.lane.b32.xlu1 %v4658_v39, %s4485_s29 }
0x13d1   :  { %2873 = vrot.lane.b32.xlu1 %v4854_v10, %s4485_s29 }
0x143d   :  { %v2608_v62 = vpop.xlane.xlu1 %2607 }
0x143e   :  { %v2609_v37 = vsub.f32 %v2603_v49, %v2608_v62 }
0x1440   :  { %v2610_v47 = vmul.f32 1.442695, %v2609_v37 }
0x1441   :  { %v2793_v63 = vpop.permute.xlu1 %2792 }
0x1442   :  { %4434 = vpow2.f32 %v2610_v47  ;;  %4275 = vmatpush3.msra.mxu1 %v2793_v63 }
0x1443   :  { %4276 = vmatprep.subr.mxu1 %v4481_v9 }
0x1445   :  { %v2620_v10 = vpop.permute.xlu1 %2619 }
0x1449   :  { %v2618_v18 = vpop.permute.xlu1 %2617 }
0x144d   :  { %v2779_v0 = vpop.xlane.xlu0 %2778 }
0x144e   :  { %v2780_v6 = vsub.f32 %v2774_v55, %v2779_v0 }
0x144f   :  { %v4435_v11 = vpop.eup %4434 }
0x1450   :  { %v2781_v48 = vmul.f32 1.442695, %v2780_v6  ;;  %v2612_v12 = vsel %vm46_vm0, %v4435_v11, 0.0 }
0x1451   :  { %2613 = vadd.xlane.f32.xlu0 %v2612_v12 }
0x1452   :  { %4436 = vpow2.f32 %v2781_v48 }
0x145f   :  { %v4437_v14 = vpop.eup %4436 }
0x1460   :  { %v2783_v15 = vsel %vm46_vm0, %v4437_v14, 0.0 }
0x1461   :  { %2784 = vadd.xlane.f32.xlu1 %v2783_v15 }
0x1467   :  { %2621 = vrot.lane.b32.xlu0 %v4670_v45, %s4485_s29 }
0x146b   :  { %2790 = vrot.lane.b32.xlu0 %v4966_v60, %s4486_s1 }
0x146f   :  { %2788 = vrot.lane.b32.xlu0 %v4658_v39, %s4486_s1 }
0x1472   :  { %3055 = vrot.lane.b32.xlu1 %v4880_v43, %s4485_s29 }
0x1473   :  { %2870 = vrot.lane.b32.xlu0 %v4640_v29, %s4487_s16  ;;  %v2874_v29 = vpop.permute.xlu1 %2873 }
0x1477   :  { %3052 = vrot.lane.b32.xlu0 %v4638_v27, %s4489_s28 }
0x14da   :  { %v2614_v16 = vpop.xlane.xlu0 %2613 }
0x14db   :  { %4438 = vrcp.f32 %v2614_v16 }
0x14de   :  { %v2622_v17 = vpop.permute.xlu0 %2621 }
0x14df   :  { %4261 = vmatpush3.msra.mxu0 %v2622_v17 }
0x14e0   :  { %4262 = vmatprep.subr.mxu0 %v4481_v9 }
0x14e1   :  { %4263 = vmatpush3.msra.mxu0 %v2620_v10 }
0x14e2   :  { %4264 = vmatprep.subr.mxu0 %v4481_v9  ;;  %v2791_v19 = vpop.permute.xlu0 %2790 }
0x14e3   :  { %4265 = vmatpush3.msra.mxu0 %v2618_v18  ;;  %4277 = vmatpush3.msra.mxu1 %v2791_v19 }
0x14e4   :  { %4278 = vmatprep.subr.mxu1 %v4481_v9  ;;  %4283 = vmatprep.subr.mxu0 %v4481_v9 }
0x14e6   :  { %v2789_v43 = vpop.permute.xlu0 %2788 }
0x14e7   :  { %4279 = vmatpush3.msra.mxu1 %v2789_v43 }
0x14e8   :  { %v4439_v2 = vpop.eup %4438  ;;  %4297 = vmatprep.subr.mxu1 %v4481_v9 }
0x14e9   :  { %v2616_v21 = vmul.f32 %v4439_v2, %v4435_v11 }
0x14ea   :  { %v2785_v22 = vpop.xlane.xlu1 %2784  ;;  %v2871_v24 = vpop.permute.xlu0 %2870 }
0x14eb   :  { %4440 = vrcp.f32 %v2785_v22  ;;  %4267 = vmatmul.mubr.msk.f32.vlgmr.msra.gmra.mxu0 %vm46_vm0, %v2616_v21 }
0x14ec   :  { %4284 = vmatpush3.msra.mxu0 %v2874_v29  ;;  %4285 = vmatprep.mubr.msk.f32.mxu0 %vm4482_vm1, %v4481_v9 }
0x14ed   :  { %4288 = vmatprep.subr.mxu0 %v4481_v9 }
0x14ee   :  { %v3056_v44 = vpop.permute.xlu1 %3055  ;;  %v3053_v4 = vpop.permute.xlu0 %3052 }
0x14ef   :  { %4286 = vmatmul.mubr.msk.f32.vlgmr.msra.gmra.mxu0 %vm470_vm2, %v2871_v24 }
0x14f0   :  { %4294 = vmatprep.mubr.msk.f32.mxu0 %vm4482_vm1, %v4481_v9 }
0x14f8   :  { %v4441_v42 = vpop.eup %4440 }
0x14f9   :  { %v2787_v33 = vmul.f32 %v4441_v42, %v4437_v14 }
0x14fb   :  { %4281 = vmatmul.mubr.msk.f32.vlgmr.msra.gmra.mxu1 %vm46_vm0, %v2787_v33 }
0x14fc   :  { %4298 = vmatpush3.msra.mxu1 %v3056_v44  ;;  %4299 = vmatprep.mubr.msk.f32.mxu1 %vm4482_vm1, %v4481_v9 }
0x14fd   :  { %4302 = vmatprep.subr.mxu1 %v4481_v9 }
0x14ff   :  { %4300 = vmatmul.mubr.msk.f32.vlgmr.msra.gmra.mxu1 %vm470_vm2, %v3053_v4 }
0x1500   :  { %4308 = vmatprep.mubr.msk.f32.mxu1 %vm4482_vm1, %v4481_v9 }
0x15ab   :  { %v5117_v35 = vpop.f32.mrf.mxu0 }
0x15ad   :  { %v4268_v26 = vpop.f32.mrf.mxu0 }
0x15af   :  { %v2944_v28 = vpop.f32.mrf.mxu0 }
0x15b0   :  { %v2945_v30 = vadd.f32 %v2944_v28, %v4787_v8 }
0x15b1   :  { %v4287_v41 = vpop.f32.mrf.mxu0 }
0x15b2   :  { %v2948_v31 = vsel %vm46_vm0, %v2945_v30, -inf }
0x15b3   :  { %2949 = vmax.xlane.f32.xlu1 %v2948_v31 }
0x15bb   :  { %v5121_v34 = vpop.f32.mrf.mxu1 }
0x15bd   :  { %v4282_v36 = vpop.f32.mrf.mxu1 }
0x15bf   :  { %v3126_v46 = vpop.f32.mrf.mxu1 }
0x15c0   :  { %v3127_v49 = vadd.f32 %v3126_v46, %v4912_v61 }
0x15c1   :  { %v4301_v50 = vpop.f32.mrf.mxu1 }
0x15c2   :  { %v3130_v51 = vsel %vm46_vm0, %v3127_v49, -inf }
0x15c3   :  { %3131 = vmax.xlane.f32.xlu0 %v3130_v51 }
0x15c4   :  { %3145 = vrot.lane.b32.xlu1 %v4670_v45, %s4489_s28 }
0x15c8   :  { %2961 = vrot.lane.b32.xlu1 %v4966_v60, %s4487_s16 }
0x15cc   :  { %2959 = vrot.lane.b32.xlu1 %v4658_v39, %s4487_s16 }
0x15d0   :  { %3226 = vrot.lane.b32.xlu1 %v4897_v57, %s4485_s29 }
0x163c   :  { %v2950_v8 = vpop.xlane.xlu1 %2949 }
0x163d   :  { %v2951_v32 = vsub.f32 %v2945_v30, %v2950_v8 }
0x163f   :  { %v2952_v25 = vmul.f32 1.442695, %v2951_v32 }
0x1640   :  { %v3146_v55 = vpop.permute.xlu1 %3145 }
0x1641   :  { %4442 = vpow2.f32 %v2952_v25  ;;  %4303 = vmatpush3.msra.mxu1 %v3146_v55 }
0x1642   :  { %4304 = vmatprep.subr.mxu1 %v4481_v9 }
0x1644   :  { %v2962_v57 = vpop.permute.xlu1 %2961 }
0x1648   :  { %v2960_v48 = vpop.permute.xlu1 %2959 }
0x164c   :  { %v3132_v56 = vpop.xlane.xlu0 %3131 }
0x164d   :  { %v3133_v59 = vsub.f32 %v3127_v49, %v3132_v56 }
0x164e   :  { %v4443_v62 = vpop.eup %4442 }
0x164f   :  { %v3134_v37 = vmul.f32 1.442695, %v3133_v59  ;;  %v2954_v47 = vsel %vm46_vm0, %v4443_v62, 0.0 }
0x1650   :  { %2955 = vadd.xlane.f32.xlu0 %v2954_v47 }
0x1651   :  { %4444 = vpow2.f32 %v3134_v37 }
0x165e   :  { %v4445_v63 = vpop.eup %4444 }
0x165f   :  { %v3136_v0 = vsel %vm46_vm0, %v4445_v63, 0.0 }
0x1660   :  { %3137 = vadd.xlane.f32.xlu1 %v3136_v0 }
0x1666   :  { %2963 = vrot.lane.b32.xlu0 %v4670_v45, %s4487_s16 }
0x166a   :  { %3143 = vrot.lane.b32.xlu0 %v4966_v60, %s4489_s28 }
0x166e   :  { %3141 = vrot.lane.b32.xlu0 %v4658_v39, %s4489_s28 }
0x1671   :  { %3397 = vrot.lane.b32.xlu1 %v4948_v54, %s4485_s29  ;;  %v3227_v54 = vpop.permute.xlu1 %3226  ;;  %s4495_s29 = smov [#allocation2]  }
0x1672   :  { %3223 = vrot.lane.b32.xlu0 %v4638_v27, %s4488_s0  ;;  %s3769_s1 = sshll.u32 %s4495_s29, 4  ;;  %s3770_s1 = int_to_ptr.vmem [resolvable:$true] %s3769_s1 }
0x1673   :  { %p4463_p1 = scmp.lt.s32.totalorder %s3770_s1, %s3770_s1 }
0x1676   :  { %3394 = vrot.lane.b32.xlu0 %v4638_v27, %s4490_s4 }
0x16d9   :  { %v2956_v6 = vpop.xlane.xlu0 %2955 }
0x16da   :  { %4446 = vrcp.f32 %v2956_v6  ;;  %v3856_v6 = vld [vmem:[%s5284_s3 + $0x80] sm:$0xff] }
0x16dd   :  { %v2964_v11 = vpop.permute.xlu0 %2963 }
0x16de   :  { %4289 = vmatpush3.msra.mxu0 %v2964_v11 }
0x16df   :  { %4290 = vmatprep.subr.mxu0 %v4481_v9 }
0x16e0   :  { %4291 = vmatpush3.msra.mxu0 %v2962_v57  ;;  %v3857_v57 = vld [vmem:[%s5284_s3 + $0x88] sm:$0xff] }
0x16e1   :  { %4292 = vmatprep.subr.mxu0 %v4481_v9  ;;  %v3144_v12 = vpop.permute.xlu0 %3143 }
0x16e2   :  { %4293 = vmatpush3.msra.mxu0 %v2960_v48  ;;  %4305 = vmatpush3.msra.mxu1 %v3144_v12 }
0x16e3   :  { %4306 = vmatprep.subr.mxu1 %v4481_v9  ;;  %4311 = vmatprep.subr.mxu0 %v4481_v9 }
0x16e5   :  { %v3142_v27 = vpop.permute.xlu0 %3141 }
0x16e6   :  { %4307 = vmatpush3.msra.mxu1 %v3142_v27 }
0x16e7   :  { %v4447_v14 = vpop.eup %4446  ;;  %4325 = vmatprep.subr.mxu1 %v4481_v9 }
0x16e8   :  { %v2958_v15 = vmul.f32 %v4447_v14, %v4443_v62 }
0x16e9   :  { %v3138_v10 = vpop.xlane.xlu1 %3137  ;;  %v3224_v16 = vpop.permute.xlu0 %3223 }
0x16ea   :  { %4448 = vrcp.f32 %v3138_v10  ;;  %4295 = vmatmul.mubr.msk.f32.vlgmr.msra.gmra.mxu0 %vm46_vm0, %v2958_v15  ;;  %v3851_v10 = vld [vmem:[%s5284_s3 + $0x58] sm:$0xff] }
0x16eb   :  { %4312 = vmatpush3.msra.mxu0 %v3227_v54  ;;  %4313 = vmatprep.mubr.msk.f32.mxu0 %vm4482_vm1, %v4481_v9 }
0x16ec   :  { %4316 = vmatprep.subr.mxu0 %v4481_v9 }
0x16ed   :  { %v3398_v19 = vpop.permute.xlu1 %3397  ;;  %v3395_v29 = vpop.permute.xlu0 %3394 }
0x16ee   :  { %4314 = vmatmul.mubr.msk.f32.vlgmr.msra.gmra.mxu0 %vm470_vm2, %v3224_v16 }
0x16ef   :  { %4322 = vmatprep.mubr.msk.f32.mxu0 %vm4482_vm1, %v4481_v9 }
0x16f7   :  { %v4449_v17 = vpop.eup %4448 }
0x16f8   :  { %v3140_v18 = vmul.f32 %v4449_v17, %v4445_v63  ;;  %v3850_v17 = vld [vmem:[%s5284_s3 + $0x50] sm:$0xff] }
0x16fa   :  { %4309 = vmatmul.mubr.msk.f32.vlgmr.msra.gmra.mxu1 %vm46_vm0, %v3140_v18 }
0x16fb   :  { %4326 = vmatpush3.msra.mxu1 %v3398_v19  ;;  %4327 = vmatprep.mubr.msk.f32.mxu1 %vm4482_vm1, %v4481_v9 }
0x16fc   :  { %4330 = vmatprep.subr.mxu1 %v4481_v9 }
0x16fe   :  { %4328 = vmatmul.mubr.msk.f32.vlgmr.msra.gmra.mxu1 %vm470_vm2, %v3395_v29 }
0x16ff   :  { %4336 = vmatprep.mubr.msk.f32.mxu1 %vm4482_vm1, %v4481_v9 }
0x17aa   :  { %v3037_v43 = vpop.f32.mrf.mxu0 }
0x17ac   :  { %v4296_v2 = vpop.f32.mrf.mxu0 }
0x17ae   :  { %v3297_v21 = vpop.f32.mrf.mxu0 }
0x17af   :  { %v3298_v22 = vadd.f32 %v3297_v21, %v4912_v61 }
0x17b0   :  { %v4315_v24 = vpop.f32.mrf.mxu0 }
0x17b1   :  { %v3301_v42 = vsel %vm46_vm0, %v3298_v22, -inf }
0x17b2   :  { %3302 = vmax.xlane.f32.xlu1 %v3301_v42 }
0x17ba   :  { %v5169_v33 = vpop.f32.mrf.mxu1 }
0x17bc   :  { %v4310_v44 = vpop.f32.mrf.mxu1 }
0x17be   :  { %v3468_v4 = vpop.f32.mrf.mxu1 }
0x17bf   :  { %v3469_v26 = vadd.f32 %v3468_v4, %v4912_v61 }
0x17c0   :  { %v4329_v28 = vpop.f32.mrf.mxu1 }
0x17c1   :  { %v3472_v30 = vsel %vm46_vm0, %v3469_v26, -inf }
0x17c2   :  { %3473 = vmax.xlane.f32.xlu0 %v3472_v30 }
0x17c3   :  { %3487 = vrot.lane.b32.xlu1 %v4670_v45, %s4490_s4 }
0x17c7   :  { %3314 = vrot.lane.b32.xlu1 %v4966_v60, %s4488_s0 }
0x183b   :  { %v3303_v41 = vpop.xlane.xlu1 %3302 }
0x183c   :  { %v3304_v31 = vsub.f32 %v3298_v22, %v3303_v41 }
0x183e   :  { %v3305_v36 = vmul.f32 1.442695, %v3304_v31 }
0x183f   :  { %v3488_v46 = vpop.permute.xlu1 %3487 }
0x1840   :  { %4450 = vpow2.f32 %v3305_v36  ;;  %4331 = vmatpush3.msra.mxu1 %v3488_v46 }
0x1841   :  { %4332 = vmatprep.subr.mxu1 %v4481_v9 }
0x184b   :  { %v3474_v49 = vpop.xlane.xlu0 %3473 }
0x184c   :  { %v3475_v61 = vsub.f32 %v3469_v26, %v3474_v49  ;;  %v3677_v49 = vld [vmem:[%s5287_s6] sm:$0xff] }
0x184d   :  { %v4451_v50 = vpop.eup %4450 }
0x184e   :  { %v3476_v51 = vmul.f32 1.442695, %v3475_v61  ;;  %v3307_v8 = vsel %vm46_vm0, %v4451_v50, 0.0 }
0x184f   :  { %3308 = vadd.xlane.f32.xlu0 %v3307_v8 }
0x1850   :  { %4452 = vpow2.f32 %v3476_v51  ;;  %v3680_v51 = vld [vmem:[%s5288_s7 + $0x8] sm:$0xff] }
0x185d   :  { %v4453_v32 = vpop.eup %4452 }
0x185e   :  { %v3478_v25 = vsel %vm46_vm0, %v4453_v32, 0.0 }
0x185f   :  { %3479 = vadd.xlane.f32.xlu1 %v3478_v25 }
0x1865   :  { %3316 = vrot.lane.b32.xlu0 %v4670_v45, %s4488_s0 }
0x1869   :  { %3485 = vrot.lane.b32.xlu0 %v4966_v60, %s4490_s4 }
0x186d   :  { %3483 = vrot.lane.b32.xlu0 %v4658_v39, %s4490_s4 }
0x1870   :  { %3312 = vrot.lane.b32.xlu1 %v4658_v39, %s4488_s0 }
0x1871   :  { %1483 = vrot.lane.b32.xlu0 %v4916_v1, %s4491_s5  ;;  %v3315_v1 = vpop.permute.xlu1 %3314 }
0x1874   :  { %1479 = vrot.lane.b32.xlu1 %v4866_v13, %s4492_s20 }
0x1875   :  { %3042 = vrot.lane.b32.xlu0 %v5121_v34, %s4492_s20 }
0x1878   :  { %1991 = vrot.lane.b32.xlu1 %v4980_v3, %s4492_s20 }
0x1879   :  { %3046 = vrot.lane.b32.xlu0 %v3037_v43, %s4491_s5 }
0x187c   :  { %1995 = vrot.lane.b32.xlu1 %v5017_v52, %s4491_s5 }
0x18d8   :  { %v3309_v39 = vpop.xlane.xlu0 %3308 }
0x18d9   :  { %4454 = vrcp.f32 %v3309_v39 }
0x18dc   :  { %v3317_v45 = vpop.permute.xlu0 %3316 }
0x18dd   :  { %4317 = vmatpush3.msra.mxu0 %v3317_v45 }
0x18de   :  { %4318 = vmatprep.subr.mxu0 %v4481_v9 }
0x18df   :  { %4319 = vmatpush3.msra.mxu0 %v3315_v1 }
0x18e0   :  { %v3486_v13 = vpop.permute.xlu0 %3485  ;;  %4320 = vmatprep.subr.mxu0 %v4481_v9 }
0x18e1   :  { %4333 = vmatpush3.msra.mxu1 %v3486_v13 }
0x18e2   :  { %4334 = vmatprep.subr.mxu1 %v4481_v9 }
0x18e4   :  { %v3484_v60 = vpop.permute.xlu0 %3483 }
0x18e5   :  { %4335 = vmatpush3.msra.mxu1 %v3484_v60 }
0x18e6   :  { %v4455_v34 = vpop.eup %4454 }
0x18e7   :  { %v3311_v55 = vmul.f32 %v4455_v34, %v4451_v50 }
0x18e8   :  { %v3480_v3 = vpop.xlane.xlu1 %3479  ;;  %v1484_v37 = vpop.permute.xlu0 %1483 }
0x18e9   :  { %4456 = vrcp.f32 %v3480_v3 }
0x18ec   :  { %v3313_v52 = vpop.permute.xlu1 %3312  ;;  %v3043_v9 = vpop.permute.xlu0 %3042 }
0x18ed   :  { %4321 = vmatpush3.msra.mxu0 %v3313_v52  ;;  %v3049_v12 = vsel %vm470_vm2, %v5117_v35, %v3043_v9  ;;  %v3853_v35 = vld [vmem:[%s5284_s3 + $0x68] sm:$0xff] }
0x18ee   :  { %4323 = vmatmul.mubr.msk.f32.vlgmr.msra.gmra.mxu0 %vm46_vm0, %v3311_v55  ;;  %4339 = vmatprep.subr.mxu0 %v3857_v57 }
0x18ef   :  { %4340 = vmatpush3.msra.mxu0 %v3857_v57 }
0x18f0   :  { %v1480_v63 = vpop.permute.xlu1 %1479  ;;  %v3047_v11 = vpop.permute.xlu0 %3046  ;;  %4341 = vmatprep.subr.mxu0 %v3856_v6 }
0x18f1   :  { %v1486_v54 = vsel %vm470_vm2, %v4822_v40, %v1480_v63  ;;  %v3050_v27 = vsel %vm974_vm3, %v3049_v12, %v3047_v11  ;;  %4342 = vmatpush3.msra.mxu0 %v3856_v6 }
0x18f2   :  { %v1487_v40 = vsel %vm974_vm3, %v1486_v54, %v1484_v37 }
0x18f4   :  { %v1992_v48 = vpop.permute.xlu1 %1991 }
0x18f5   :  { %v1998_v15 = vsel %vm470_vm2, %v4976_v20, %v1992_v48  ;;  %v3849_v20 = vld [vmem:[%s5284_s3 + $0x48] sm:$0xff] }
0x18f6   :  { %v4457_v56 = vpop.eup %4456 }
0x18f7   :  { %v3482_v59 = vmul.f32 %v4457_v56, %v4453_v32  ;;  %v3679_v32 = vld [vmem:[%s5288_s7] sm:$0xff] }
0x18f8   :  { %v1996_v14 = vpop.permute.xlu1 %1995 }
0x18f9   :  { %4337 = vmatmul.mubr.msk.f32.vlgmr.msra.gmra.mxu1 %vm46_vm0, %v3482_v59  ;;  %v1999_v16 = vsel %vm974_vm3, %v1998_v15, %v1996_v14 }
0x18fa   :  { %4364 = vmatprep.mubr.msk.f32.mxu1 %vm974_vm3, %v3677_v49 }
0x19ae   :  { %v3390_v62 = vpop.f32.mrf.mxu0 }
0x19af   :  { %3566 = vrot.lane.b32.xlu1 %v3390_v62, %s4492_s20 }
0x19b0   :  { %v4324_v47 = vpop.f32.mrf.mxu0 }
0x19b3   :  { %966 = vrot.lane.b32.xlu1 %v4752_v38, %s4492_s20 }
0x19b7   :  { %2518 = vrot.lane.b32.xlu1 %v5067_v23, %s4492_s20  ;;  %v3855_v23 = vld [vmem:[%s5284_s3 + $0x78] sm:$0xff] }
0x19b8   :  { %4343 = vmatprep.subr.mxu0 %v3855_v23 }
0x19b9   :  { %v3561_v0 = vpop.f32.mrf.mxu1  ;;  %4344 = vmatpush3.msra.mxu0 %v3855_v23 }
0x19ba   :  { %3570 = vrot.lane.b32.xlu0 %v3561_v0, %s4491_s5 }
0x19bb   :  { %2522 = vrot.lane.b32.xlu1 %v5071_v53, %s4491_s5  ;;  %v4338_v38 = vpop.f32.mrf.mxu1  ;;  %v3854_v53 = vld [vmem:[%s5284_s3 + $0x70] sm:$0xff] }
0x19bc   :  { %4345 = vmatprep.subr.mxu0 %v3854_v53 }
0x19bd   :  { %4346 = vmatpush3.msra.mxu0 %v3854_v53 }
0x19be   :  { %970 = vrot.lane.b32.xlu0 %v4782_v5, %s4491_s5  ;;  %v3852_v5 = vld [vmem:[%s5284_s3 + $0x60] sm:$0xff]  ;;  %4347 = vmatprep.subr.mxu0 %v3853_v35 }
0x19bf   :  { %3576 = vrot.lane.b32.xlu1 %v3050_v27, %s4493_s2  ;;  %4348 = vmatpush3.msra.mxu0 %v3853_v35 }
0x19c0   :  { %4349 = vmatprep.subr.mxu0 %v3852_v5 }
0x19c1   :  { %4350 = vmatpush3.msra.mxu0 %v3852_v5 }
0x19c2   :  { %2001 = vrot.lane.b32.xlu0 %v1487_v40, %s4493_s2  ;;  %4351 = vmatprep.subr.mxu0 %v3851_v10 }
0x19c3   :  { %4352 = vmatpush3.msra.mxu0 %v3851_v10 }
0x19c4   :  { %4353 = vmatprep.subr.mxu0 %v3850_v17 }
0x19c5   :  { %4354 = vmatpush3.msra.mxu0 %v3850_v17 }
0x19c6   :  { %2005 = vrot.lane.b32.xlu0 %v1999_v16, %s4494_s24  ;;  %4355 = vmatprep.subr.mxu0 %v3849_v20 }
0x19c7   :  { %4356 = vmatpush3.msra.mxu0 %v3849_v20 }
0x1a21   :  { %v3567_v18 = vpop.permute.xlu1 %3566 }
0x1a22   :  { %v3573_v19 = vsel %vm470_vm2, %v5169_v33, %v3567_v18 }
0x1a25   :  { %v967_v21 = vpop.permute.xlu1 %966 }
0x1a26   :  { %v973_v24 = vsel %vm470_vm2, %v4717_v7, %v967_v21 }
0x1a29   :  { %v2519_v33 = vpop.permute.xlu1 %2518 }
0x1a2a   :  { %v2525_v41 = vsel %vm470_vm2, %v5021_v58, %v2519_v33  ;;  %v3678_v58 = vld [vmem:[%s5287_s6 + $0x8] sm:$0xff]  ;;  %s4458_s6 = scalar_lea.vmem %s3770_s1, 256 }
0x1a2b   :  { %p4459_p0 = scmp.ne.s32.totalorder %s3770_s1, %s4458_s6  ;;  %p4464_p2 = scmp.lt.s32.totalorder %s4458_s6, %s4458_s6 }
0x1a2c   :  { %v3571_v29 = vpop.permute.xlu0 %3570 }
0x1a2d   :  { %v3574_v43 = vsel %vm974_vm3, %v3573_v19, %v3571_v29  ;;  %v2523_v28 = vpop.permute.xlu1 %2522  ;;  %p4465_p3 = por %p4464_p2, %p4463_p1 }
0x1a2e   :  { %3580 = vrot.lane.b32.xlu0 %v3574_v43, %s4494_s24  ;;  %v2526_v31 = vsel %vm974_vm3, %v2525_v41, %v2523_v28 }
0x1a2f   :  { %p4466_p4 = pnand %p4465_p3, %p4459_p0 }
0x1a30   :  { %v971_v2 = vpop.permute.xlu0 %970 }
0x1a31   :  { %v975_v42 = vsel %vm974_vm3, %v973_v24, %v971_v2  ;;  %v3577_v30 = vpop.permute.xlu1 %3576 }
0x1a32   :  { %v3583_v36 = vsel %vm46_vm0, %v2526_v31, %v3577_v30 }
0x1a34   :  { %v2002_v22 = vpop.permute.xlu0 %2001 }
0x1a35   :  { %v2008_v44 = vsel %vm46_vm0, %v975_v42, %v2002_v22 }
0x1a38   :  { %v2006_v4 = vpop.permute.xlu0 %2005 }
0x1a39   :  { %v2010_v26 = vsel %vm2009_vm4, %v2008_v44, %v2006_v4 }
0x1a3a   :  { %4357 = vmatprep.mubr.msk.f32.mxu0 %vm3595_vm5, %v2010_v26 }
0x1aa0   :  { %v3581_v7 = vpop.permute.xlu0 %3580 }
0x1aa1   :  { %v3584_v46 = vsel %vm2009_vm4, %v3583_v36, %v3581_v7 }
0x1aa2   :  { %4358 = vmatmul.mubr.msk.f32.vlgmr.msra.gmra.mxu0 %vm3595_vm5, %v3584_v46 }
0x1b62   :  { %v4359_v61 = vpop.f32.mrf.mxu0 }
0x1b63   :  { %4360 = vmatprep.subr.mxu1 %v4359_v61 }
0x1b64   :  { %v3668_v50 = vpop.f32.mrf.mxu0  ;;  %4361 = vmatpush3.msra.mxu1 %v4359_v61 }
0x1b65   :  { %4362 = vmatprep.subr.mxu1 %v3668_v50 }
0x1b66   :  { %4363 = vmatpush3.msra.mxu1 %v3668_v50 }
0x1b67   :  { %4365 = vmatmul.mubr.msk.f32.vlgmr.msra.gmra.mxu1 %vm974_vm3, %v3678_v58 }
0x1c27   :  { %v4366_v8 = vpop.f32.mrf.mxu1 }
0x1c28   :  { %v3759_v25 = vadd.f32 %v4366_v8, %v3680_v51 }
0x1c29   :  { %v3753_v39 = vpop.f32.mrf.mxu1 }
0x1c2a   :  { %3763 = vst.msk [vmem:[#allocation2 + $0x8] sm:$0xff] %vm46_vm0, %v3759_v25  ;;  %v3754_v45 = vadd.f32 %v3753_v39, %v3679_v32 }
0x1c2c   :  { %3762 = vst.msk [vmem:[#allocation2] sm:$0xff] %vm46_vm0, %v3754_v45 }
0x1c2d   :  { %4469 = shalt.err (!%p4466_p4)
}
0x1c2e   :  { %s4496_s12 = smov 128  }
0x1c2f   :  { %3775 = dma.vmem_to_hbm [thread:$0]  %s3770_s1, 256, %s5289_s8, [#allocation3], %s4496_s12, %s4496_s12, %s4492_s20  }
0x1c30   :  { %4478 = dma.done.wait [#allocation3], 256  }
0x1c31   :  { %4479 = vsyncadd [#allocation3], 4294967040 }
0x1c32   :  { %3779 = vsyncpa [#allocation3], 1 }

</bundles_post_ra>
